<compile_context>
chip_gen: v6e
topology: v6e:2x2x1
jax: 0.10.0
libtpu: 0.0.40
codegen_flags: <defaults>
</compile_context>

<pallas_src>
import jax
import jax.numpy as jnp
from jax.experimental import pallas as pl
from jax.experimental.pallas import tpu as pltpu

BN_EPS = 1e-5
LANE = 128


def _round_up(x, m):
    return (x + m - 1) // m * m


def _pick_tile_h(h):
    """Largest even row-tile <= 32 that divides H (even so the 2-row halo
    block index (t+1)*TH/2 is an integer)."""
    for th in (32, 16, 8, 4, 2):
        if h % th == 0:
            return th
    raise ValueError(f"H={h} must have an even divisor <= 32")


def _vmem_limit_bytes(per_step_bytes):
    """Double-buffered footprint + headroom, capped at 75% of physical VMEM."""
    try:
        cap = pltpu.get_tpu_info().vmem_capacity_bytes
    except Exception:
        cap = 64 * 1024 * 1024
    need = 2 * per_step_bytes + (8 << 20)
    return int(min(max(need, 16 << 20), int(cap * 0.75)))


# -----------------------------------------------------------------------------
# Pass 1: 3x3 conv (in-kernel patch build from a single TH+2-row halo) + bias,
#         bf16 pre-BN activation out, per-image BN sum/sumsq accumulation.
# -----------------------------------------------------------------------------
def conv_stats_kernel(xm_ref, xt_ref, w_ref, b_ref, y_ref, stats_ref):
    # xm_ref:    (TH, Wp, Cin)  bf16  padded input rows [t*TH, t*TH+TH)
    # xt_ref:    (2,  Wp, Cin)  bf16  bottom halo rows [(t+1)*TH, (t+1)*TH+2)
    # w_ref:     (9*Cin, Cp)    bf16  conv weight, K ordered (kh, kw, cin)
    # b_ref:     (1, Cp)        f32   conv bias
    # y_ref:     (TH, W, Cp)    bf16  pre-BN activation for this row tile
    # stats_ref: (2, Cp)        f32   per-image [sum; sum-of-squares]
    t = pl.program_id(1)

    @pl.when(t == 0)
    def _init():
        stats_ref[...] = jnp.zeros_like(stats_ref)

    th, w_out, cp = y_ref.shape
    cin = xm_ref.shape[-1]

    # (TH+2, Wp, Cin) halo from the non-overlapping main block + 2-row tail.
    halo = jnp.concatenate([xm_ref[...], xt_ref[...]], axis=0)

    # (TH*W, 9*Cin) im2col patch matrix; K ordering (kh, kw, cin) matches w.
    patches = jnp.concatenate(
        [halo[kh:kh + th, kw:kw + w_out, :].reshape(th * w_out, cin)
         for kh in range(3) for kw in range(3)],
        axis=-1)

    y = jnp.dot(patches, w_ref[...], preferred_element_type=jnp.float32)
    y = y + b_ref[...]                                   # (TH*W, Cp) f32

    y_ref[...] = y.reshape(th, w_out, cp).astype(y_ref.dtype)

    s = jnp.sum(y, axis=0, keepdims=True)
    sq = jnp.sum(y * y, axis=0, keepdims=True)
    stats_ref[...] = stats_ref[...] + jnp.concatenate([s, sq], axis=0)
    # TODO(synk): dropout branch of the module is disabled by default
    # (dropout=False, rate=0.0) and is therefore not implemented here.


def convolution_block_forward(x_nchw, weight_oihw, bias, gamma, beta):
    """Forward pass equivalent to convolution_block(in_c, out_c).forward(x)."""
    N, Cin, H, W = x_nchw.shape
    Cout, _, KH, KW = weight_oihw.shape
    assert KH == 3 and KW == 3, "kernel implements the module default 3x3 conv"

    Hp, Wp = H + 2, W + 2
    K = KH * KW * Cin
    Cp = _round_up(max(Cout, LANE), LANE)     # lane-dense output channels
    TH = _pick_tile_h(H)
    nT = H // TH

    # ---- wrapper glue: NCHW -> NHWC, spatial zero-pad, bf16 operands --------
    x_nhwc = jnp.transpose(x_nchw, (0, 2, 3, 1)).astype(jnp.bfloat16)
    xp = jnp.pad(x_nhwc, ((0, 0), (1, 1), (1, 1), (0, 0)))   # (N, Hp, Wp, Cin)

    # PyTorch OIHW weight -> (kh, kw, cin, cout) -> (K, Cout), zero-pad to Cp.
    wmat = jnp.transpose(weight_oihw, (2, 3, 1, 0)).reshape(K, Cout)
    wmat = jnp.pad(wmat, ((0, 0), (0, Cp - Cout))).astype(jnp.bfloat16)
    b2 = jnp.pad(bias.astype(jnp.float32), (0, Cp - Cout)).reshape(1, Cp)

    per_step_bytes = (TH * Wp * Cin * 2 + 2 * Wp * Cin * 2 + K * Cp * 2
                      + Cp * 4 + TH * W * Cp * 2 + 2 * Cp * 4)
    vmem_limit = _vmem_limit_bytes(per_step_bytes)

    # ---- pass 1: conv + bias + per-image BN statistics ----------------------
    y_rows, stats = pl.pallas_call(
        conv_stats_kernel,
        out_shape=(jax.ShapeDtypeStruct((N, H, W, Cp), jnp.bfloat16),
                   jax.ShapeDtypeStruct((N, 2, Cp), jnp.float32)),
        grid=(N, nT),
        in_specs=[
            # TH-row main block (non-overlapping).
            pl.BlockSpec((None, TH, Wp, Cin), lambda n, t: (n, t, 0, 0)),
            # 2-row bottom halo at element offset (t+1)*TH (block size 2).
            pl.BlockSpec((None, 2, Wp, Cin),
                         lambda n, t: (n, (t + 1) * (TH // 2), 0, 0)),
            pl.BlockSpec((K, Cp), lambda n, t: (0, 0)),
            pl.BlockSpec((1, Cp), lambda n, t: (0, 0)),
        ],
        out_specs=(pl.BlockSpec((None, TH, W, Cp), lambda n, t: (n, t, 0, 0)),
                   pl.BlockSpec((None, 2, Cp), lambda n, t: (n, 0, 0))),
        compiler_params=pltpu.CompilerParams(
            dimension_semantics=("parallel", "arbitrary"),
            vmem_limit_bytes=vmem_limit),
    )(xp, xp, wmat, b2)

    # ---- tiny per-channel glue: reduce over N, fold BN into (scale, shift) --
    cnt = jnp.float32(N * H * W)
    stats_sum = jnp.sum(stats, axis=0)                    # (2, Cp) f32
    mean = stats_sum[0, :Cout] / cnt
    var = jnp.maximum(stats_sum[1, :Cout] / cnt - mean * mean, 0.0)
    inv = jax.lax.rsqrt(var + BN_EPS)
    scale = gamma.astype(jnp.float32) * inv               # (Cout,)
    shift = beta.astype(jnp.float32) - mean * scale       # (Cout,)

    # ---- fused XLA epilogue: slice channels, affine + ReLU, NCHW transpose --
    y_c = y_rows[..., :Cout].astype(jnp.float32)          # (N, H, W, Cout)
    out_nhwc = jnp.maximum(y_c * scale + shift, 0.0)
    return jnp.transpose(out_nhwc, (0, 3, 1, 2))          # (N, Cout, H, W)


def reference_forward(x, w, b, gamma, beta):
    """Pure-JAX reference matching the PyTorch forward (training-mode BN) with
    the kernel's precision policy: bf16 conv operands, f32 accumulation and
    BN statistics, bf16 storage of the pre-BN activation."""
    y = jax.lax.conv_general_dilated(
        x.astype(jnp.bfloat16), w.astype(jnp.bfloat16),
        window_strides=(1, 1), padding=((1, 1), (1, 1)),
        dimension_numbers=("NCHW", "OIHW", "NCHW"),
        preferred_element_type=jnp.float32)
    y = y + b.reshape(1, -1, 1, 1)
    mean = jnp.mean(y, axis=(0, 2, 3), keepdims=True)
    var = jnp.mean((y - mean) ** 2, axis=(0, 2, 3), keepdims=True)
    y_q = y.astype(jnp.bfloat16).astype(jnp.float32)   # mirror bf16 intermediate
    y_n = (y_q - mean) * jax.lax.rsqrt(var + BN_EPS)
    y_n = y_n * gamma.reshape(1, -1, 1, 1) + beta.reshape(1, -1, 1, 1)
    return jnp.maximum(y_n, 0.0)


if __name__ == "__main__":
    # Small deterministic setup: N=2, in_c=4, out_c=8, H=W=16, kernel=3x3.
    N, Cin, Cout, H, W, KH, KW = 2, 4, 8, 16, 16, 3, 3

    key = jax.random.PRNGKey(0)
    kx, kw_, kb, kg, kbe = jax.random.split(key, 5)
    x = jax.random.normal(kx, (N, Cin, H, W), dtype=jnp.float32)
    weight = jax.random.normal(kw_, (Cout, Cin, KH, KW), dtype=jnp.float32) * 0.1
    bias = jax.random.normal(kb, (Cout,), dtype=jnp.float32) * 0.1
    gamma = jax.random.uniform(kg, (Cout,), dtype=jnp.float32,
                               minval=0.5, maxval=1.5)
    beta = jax.random.normal(kbe, (Cout,), dtype=jnp.float32) * 0.1

    out = convolution_block_forward(x, weight, bias, gamma, beta)
    out = jax.block_until_ready(out)

    ref = jax.block_until_ready(reference_forward(x, weight, bias, gamma, beta))
    assert out.shape == (N, Cout, H, W)
    assert jnp.allclose(out, ref, atol=2e-3, rtol=2e-3), (
        f"max abs err {jnp.max(jnp.abs(out - ref))}")

    print("KERNEL_OK")
</pallas_src>

<mosaic_0001>
module attributes {stable_mosaic.version = 11 : i64} {
  func.func @conv_stats_kernel(%arg0: i32, %arg1: i32, %arg2: memref<1x16x18x4xbf16, #tpu.memory_space<vmem>>, %arg3: memref<1x2x18x4xbf16, #tpu.memory_space<vmem>>, %arg4: memref<36x128xbf16, #tpu.memory_space<vmem>>, %arg5: memref<1x128xf32, #tpu.memory_space<vmem>>, %arg6: memref<1x16x16x128xbf16, #tpu.memory_space<vmem>>, %arg7: memref<1x2x128xf32, #tpu.memory_space<vmem>>) attributes {dimension_semantics = [#tpu.dimension_semantics<parallel>, #tpu.dimension_semantics<arbitrary>], iteration_bounds = array<i64: 2, 1>, scalar_prefetch = 0 : i64, scratch_operands = 0 : i64, tpu.core_type = #tpu.core_type<tc>, window_params = [{transform_indices = @transform_0, window_bounds = array<i64: 1, 16, 18, 4>}, {transform_indices = @transform_1, window_bounds = array<i64: 1, 2, 18, 4>}, {pipeline_mode = #tpu.pipeline_mode<synchronous>, transform_indices = @transform_2, window_bounds = array<i64: 36, 128>}, {pipeline_mode = #tpu.pipeline_mode<synchronous>, transform_indices = @transform_3, window_bounds = array<i64: 1, 128>}, {transform_indices = @transform_4, window_bounds = array<i64: 1, 16, 16, 128>}, {transform_indices = @transform_5, window_bounds = array<i64: 1, 2, 128>}]} {
    %c0_i32 = arith.constant 0 : i32
    %0 = arith.cmpi eq, %arg1, %c0_i32 : i32
    %1 = arith.extui %0 : i1 to i32
    %c0_i32_0 = arith.constant 0 : i32
    %2 = arith.cmpi ne, %1, %c0_i32_0 : i32
    scf.if %2 {
      %cst_24 = arith.constant 0.000000e+00 : f32
      %49 = vector.broadcast %cst_24 : f32 to vector<2x128xf32>
      %c0_25 = arith.constant 0 : index
      %c0_26 = arith.constant 0 : index
      %c0_27 = arith.constant 0 : index
      %50 = vector.load %arg7[%c0_25, %c0_26, %c0_27] : memref<1x2x128xf32, #tpu.memory_space<vmem>>, vector<1x2x128xf32>
      %51 = vector.shape_cast %50 : vector<1x2x128xf32> to vector<2x128xf32>
      %52 = vector.shape_cast %49 : vector<2x128xf32> to vector<1x2x128xf32>
      tpu.vector_store %arg7[%c0_25, %c0_26, %c0_27], %52 {strides = array<i32>} : memref<1x2x128xf32, #tpu.memory_space<vmem>>, vector<1x2x128xf32>,
    } else {
    }
    %c0 = arith.constant 0 : index
    %c0_1 = arith.constant 0 : index
    %c0_2 = arith.constant 0 : index
    %c0_3 = arith.constant 0 : index
    %3 = vector.load %arg2[%c0, %c0_1, %c0_2, %c0_3] : memref<1x16x18x4xbf16, #tpu.memory_space<vmem>>, vector<1x16x18x4xbf16>
    %4 = vector.shape_cast %3 : vector<1x16x18x4xbf16> to vector<16x18x4xbf16>
    %c0_4 = arith.constant 0 : index
    %c0_5 = arith.constant 0 : index
    %c0_6 = arith.constant 0 : index
    %c0_7 = arith.constant 0 : index
    %5 = vector.load %arg3[%c0_4, %c0_5, %c0_6, %c0_7] : memref<1x2x18x4xbf16, #tpu.memory_space<vmem>>, vector<1x2x18x4xbf16>
    %6 = vector.shape_cast %5 : vector<1x2x18x4xbf16> to vector<2x18x4xbf16>
    %7 = tpu.concatenate %4, %6 in 0 : vector<16x18x4xbf16>, vector<2x18x4xbf16> -> vector<18x18x4xbf16>
    %8 = vector.extract_strided_slice %7 {offsets = [0, 0, 0], sizes = [16, 16, 4], strides = [1, 1, 1]} : vector<18x18x4xbf16> to vector<16x16x4xbf16>
    %9 = vector.shape_cast %8 : vector<16x16x4xbf16> to vector<256x4xbf16>
    %10 = vector.extract_strided_slice %7 {offsets = [0, 1, 0], sizes = [16, 16, 4], strides = [1, 1, 1]} : vector<18x18x4xbf16> to vector<16x16x4xbf16>
    %11 = vector.shape_cast %10 : vector<16x16x4xbf16> to vector<256x4xbf16>
    %12 = vector.extract_strided_slice %7 {offsets = [0, 2, 0], sizes = [16, 16, 4], strides = [1, 1, 1]} : vector<18x18x4xbf16> to vector<16x16x4xbf16>
    %13 = vector.shape_cast %12 : vector<16x16x4xbf16> to vector<256x4xbf16>
    %14 = vector.extract_strided_slice %7 {offsets = [1, 0, 0], sizes = [16, 16, 4], strides = [1, 1, 1]} : vector<18x18x4xbf16> to vector<16x16x4xbf16>
    %15 = vector.shape_cast %14 : vector<16x16x4xbf16> to vector<256x4xbf16>
    %16 = vector.extract_strided_slice %7 {offsets = [1, 1, 0], sizes = [16, 16, 4], strides = [1, 1, 1]} : vector<18x18x4xbf16> to vector<16x16x4xbf16>
    %17 = vector.shape_cast %16 : vector<16x16x4xbf16> to vector<256x4xbf16>
    %18 = vector.extract_strided_slice %7 {offsets = [1, 2, 0], sizes = [16, 16, 4], strides = [1, 1, 1]} : vector<18x18x4xbf16> to vector<16x16x4xbf16>
    %19 = vector.shape_cast %18 : vector<16x16x4xbf16> to vector<256x4xbf16>
    %20 = vector.extract_strided_slice %7 {offsets = [2, 0, 0], sizes = [16, 16, 4], strides = [1, 1, 1]} : vector<18x18x4xbf16> to vector<16x16x4xbf16>
    %21 = vector.shape_cast %20 : vector<16x16x4xbf16> to vector<256x4xbf16>
    %22 = vector.extract_strided_slice %7 {offsets = [2, 1, 0], sizes = [16, 16, 4], strides = [1, 1, 1]} : vector<18x18x4xbf16> to vector<16x16x4xbf16>
    %23 = vector.shape_cast %22 : vector<16x16x4xbf16> to vector<256x4xbf16>
    %24 = vector.extract_strided_slice %7 {offsets = [2, 2, 0], sizes = [16, 16, 4], strides = [1, 1, 1]} : vector<18x18x4xbf16> to vector<16x16x4xbf16>
    %25 = vector.shape_cast %24 : vector<16x16x4xbf16> to vector<256x4xbf16>
    %26 = tpu.concatenate %9, %11, %13, %15, %17, %19, %21, %23, %25 in 1 : vector<256x4xbf16>, vector<256x4xbf16>, vector<256x4xbf16>, vector<256x4xbf16>, vector<256x4xbf16>, vector<256x4xbf16>, vector<256x4xbf16>, vector<256x4xbf16>, vector<256x4xbf16> -> vector<256x36xbf16>
    %c0_8 = arith.constant 0 : index
    %c0_9 = arith.constant 0 : index
    %27 = vector.load %arg4[%c0_8, %c0_9] : memref<36x128xbf16, #tpu.memory_space<vmem>>, vector<36x128xbf16>
    %cst = arith.constant dense<0.000000e+00> : vector<256x128xf32>
    %28 = tpu.matmul %26, %27, %cst {dimension_numbers = #tpu.dot_dimension_numbers<[1], [0], [0], [1], [0, 0, 1, 1], [], []>} : vector<256x36xbf16>, vector<36x128xbf16>, vector<256x128xf32> -> vector<256x128xf32>
    %c0_10 = arith.constant 0 : index
    %c0_11 = arith.constant 0 : index
    %29 = vector.load %arg5[%c0_10, %c0_11] : memref<1x128xf32, #tpu.memory_space<vmem>>, vector<1x128xf32>
    %30 = vector.broadcast %29 : vector<1x128xf32> to vector<256x128xf32>
    %31 = arith.addf %28, %30 : vector<256x128xf32>
    %32 = vector.shape_cast %31 : vector<256x128xf32> to vector<16x16x128xf32>
    %33 = arith.truncf %32 : vector<16x16x128xf32> to vector<16x16x128xbf16>
    %c0_12 = arith.constant 0 : index
    %c0_13 = arith.constant 0 : index
    %c0_14 = arith.constant 0 : index
    %c0_15 = arith.constant 0 : index
    %34 = vector.load %arg6[%c0_12, %c0_13, %c0_14, %c0_15] : memref<1x16x16x128xbf16, #tpu.memory_space<vmem>>, vector<1x16x16x128xbf16>
    %35 = vector.shape_cast %34 : vector<1x16x16x128xbf16> to vector<16x16x128xbf16>
    %36 = vector.shape_cast %33 : vector<16x16x128xbf16> to vector<1x16x16x128xbf16>
    tpu.vector_store %arg6[%c0_12, %c0_13, %c0_14, %c0_15], %36 {strides = array<i32>} : memref<1x16x16x128xbf16, #tpu.memory_space<vmem>>, vector<1x16x16x128xbf16>,
    %cst_16 = arith.constant dense<0.000000e+00> : vector<128xf32>
    %37 = vector.multi_reduction <add>, %31, %cst_16 [0] : vector<256x128xf32> to vector<128xf32>
    %38 = vector.shape_cast %37 : vector<128xf32> to vector<1x128xf32>
    %39 = arith.mulf %31, %31 : vector<256x128xf32>
    %cst_17 = arith.constant dense<0.000000e+00> : vector<128xf32>
    %40 = vector.multi_reduction <add>, %39, %cst_17 [0] : vector<256x128xf32> to vector<128xf32>
    %41 = vector.shape_cast %40 : vector<128xf32> to vector<1x128xf32>
    %c0_18 = arith.constant 0 : index
    %c0_19 = arith.constant 0 : index
    %c0_20 = arith.constant 0 : index
    %42 = vector.load %arg7[%c0_18, %c0_19, %c0_20] : memref<1x2x128xf32, #tpu.memory_space<vmem>>, vector<1x2x128xf32>
    %43 = vector.shape_cast %42 : vector<1x2x128xf32> to vector<2x128xf32>
    %44 = tpu.concatenate %38, %41 in 0 : vector<1x128xf32>, vector<1x128xf32> -> vector<2x128xf32>
    %45 = arith.addf %43, %44 : vector<2x128xf32>
    %c0_21 = arith.constant 0 : index
    %c0_22 = arith.constant 0 : index
    %c0_23 = arith.constant 0 : index
    %46 = vector.load %arg7[%c0_21, %c0_22, %c0_23] : memref<1x2x128xf32, #tpu.memory_space<vmem>>, vector<1x2x128xf32>
    %47 = vector.shape_cast %46 : vector<1x2x128xf32> to vector<2x128xf32>
    %48 = vector.shape_cast %45 : vector<2x128xf32> to vector<1x2x128xf32>
    tpu.vector_store %arg7[%c0_21, %c0_22, %c0_23], %48 {strides = array<i32>} : memref<1x2x128xf32, #tpu.memory_space<vmem>>, vector<1x2x128xf32>,
    return
  }
  func.func @transform_0(%arg0: i32, %arg1: i32) -> (i32, i32, i32, i32) {
    %c0_i32 = arith.constant 0 : i32
    %c0_i32_0 = arith.constant 0 : i32
    %c0_i32_1 = arith.constant 0 : i32
    return %arg0, %arg1, %c0_i32, %c0_i32_0 : i32, i32, i32, i32
  }
  func.func @transform_1(%arg0: i32, %arg1: i32) -> (i32, i32, i32, i32) {
    %c1_i32 = arith.constant 1 : i32
    %0 = arith.addi %arg1, %c1_i32 : i32
    %c8_i32 = arith.constant 8 : i32
    %1 = arith.muli %0, %c8_i32 : i32
    %c0_i32 = arith.constant 0 : i32
    %c0_i32_0 = arith.constant 0 : i32
    %c0_i32_1 = arith.constant 0 : i32
    return %arg0, %1, %c0_i32, %c0_i32_0 : i32, i32, i32, i32
  }
  func.func @transform_2(%arg0: i32, %arg1: i32) -> (i32, i32) {
    %c0_i32 = arith.constant 0 : i32
    %c0_i32_0 = arith.constant 0 : i32
    %c0_i32_1 = arith.constant 0 : i32
    return %c0_i32, %c0_i32_0 : i32, i32
  }
  func.func @transform_3(%arg0: i32, %arg1: i32) -> (i32, i32) {
    %c0_i32 = arith.constant 0 : i32
    %c0_i32_0 = arith.constant 0 : i32
    %c0_i32_1 = arith.constant 0 : i32
    return %c0_i32, %c0_i32_0 : i32, i32
  }
  func.func @transform_4(%arg0: i32, %arg1: i32) -> (i32, i32, i32, i32) {
    %c0_i32 = arith.constant 0 : i32
    %c0_i32_0 = arith.constant 0 : i32
    %c0_i32_1 = arith.constant 0 : i32
    return %arg0, %arg1, %c0_i32, %c0_i32_0 : i32, i32, i32, i32
  }
  func.func @transform_5(%arg0: i32, %arg1: i32) -> (i32, i32, i32) {
    %c0_i32 = arith.constant 0 : i32
    %c0_i32_0 = arith.constant 0 : i32
    %c0_i32_1 = arith.constant 0 : i32
    return %arg0, %c0_i32, %c0_i32_0 : i32, i32, i32
  }
}

</mosaic_0001>

<bundles_post_ra>
// kernel: tpu_custom_call.1
= control target key start
LH: loop header
LB: loop body
LE: loop exit
PB: predicated region body
PF: predicated region fallthrough
CT: control target
= control target key end

     0   :  { %11 = vsyncpa [#allocation3], 0  ;;  %s4074_s0 = inlined_call_operand.vmem [shape: bf16[2,18,18,4], index: 0, kind: input, shape index: {}]   ;;  %s4075_s1 = inlined_call_operand.vmem [shape: bf16[2,18,18,4], index: 1, kind: input, shape index: {}]   ;;  %s4076_s2 = inlined_call_operand.vmem [shape: bf16[36,128], index: 2, kind: input, shape index: {}]   ;;  %s4077_s3 = inlined_call_operand.vmem [shape: f32[1,128], index: 3, kind: input, shape index: {}]   ;;  %s4078_s4 = inlined_call_operand.hbm [shape: bf16[2,16,16,128], index: 4, kind: output, shape index: {0}]   ;;  %s4079_s5 = inlined_call_operand.hbm [shape: f32[2,2,128], index: 5, kind: output, shape index: {1}]  }
   0x1   :  { %13 = vsyncpa [#allocation3 + $0x1], 0 }
   0x2   :  { %14 = vsyncpa [#allocation5], 0 }
   0x3   :  { %16 = vsyncpa [#allocation5 + $0x1], 0  ;;  %s2967_s18 = smov 0   ;;  %s2969_s19 = smov 0  }
   0x4   :  { %s2971_s20 = smov 0   ;;  %s2973_s21 = smov 0  }
   0x5   :  { %s2975_s22 = smov 0   ;;  %s2977_s23 = smov 0  }
   0x6 LB: > { %s2388_s24 = sadd.s32 4294967295, %s2923_s23   ;;  %s2389_s25 = sadd.s32 4294967294, %s2923_s23   ;;  %s2923_s23 = sphi %s2977_s23, %s22_s23   ;;  %s2919_s22 = sphi %s2975_s22, %s4090_s22   ;;  %s2915_s21 = sphi %s2973_s21, %s4089_s21   ;;  %s2911_s20 = sphi %s2971_s20, %s4088_s20   ;;  %s2907_s19 = sphi %s2969_s19, %s4087_s19   ;;  %s2903_s18 = sphi %s2967_s18, %s4086_s18  }
   0x7   : > { %s34_s26 = sadd.s32 1, %s2919_s22  ;;  %s145_s27 = sadd.s32 1, %s2911_s20 }
   0x8   : > { %p36_p0 = scmp.ge.s32.totalorder %s34_s26, 2  ;;  %p155_p1 = scmp.ne.s32.totalorder %s2911_s20, %s2907_s19 }
   0x9   : > { %p156_p2 = scmp.eq.s32.totalorder %s2388_s24, 1  ;;  %p161_p3 = scmp.ne.s32.totalorder %s2907_s19, %s2903_s18 }
   0xa   : > { %s4092_s26 = smov (%p36_p0, %s34_s26), 0  ;;  %p162_p5 = scmp.eq.s32.totalorder %s2389_s25, 1 }
   0xb   : > { %p3007_p4 = por %p156_p2, %p155_p1  ;;  %s140_s29 = ssub.s32 %s2919_s22, %s4092_s26 }
   0xc   : > { %p2392_p6 = scmp.ge.s32.totalorder %s2923_s23, 1  ;;  %p143_p7 = scmp.eq.s32.totalorder %s140_s29, 0 }
   0xd   : > { %p3014_p8 = por %p162_p5, %p161_p3  ;;  %p254_p9 = scmp.lt.s32.totalorder %s2923_s23, 3 }
   0xe   : > { %s3020_s6 = scalar_select %p143_p7, %s2911_s20, %s145_s27  }
   0xf   : > { %p255_p10 = pnand %p2392_p6, %p254_p9 }
  0x10   : > { %p315_p11 = scmp.lt.s32.totalorder (!%p255_p10), %s2915_s21, 1  ;;  %s2925_s12 = smov (!%p255_p10), 12  }
  0x11   : > { %258 = sbr.rel (%p255_p10) target bundleno = 653 (0x28d), region = 36  ;;  %s2926_s13 = smov (!%p255_p10), 20  }
  0x12   : > { %s2927_s14 = smov (!%p255_p10), 8   ;;  %s2928_s15 = smov (!%p255_p10), 4  }
  0x13   : > { %s2929_s16 = smov (!%p255_p10), 16   ;;  %s2930_s17 = smov (!%p255_p10), 24  }
  0x14   : > { %s2931_s24 = smov (!%p255_p10), 28   ;;  %s2932_s25 = smov (!%p255_p10), 32  }
  0x15   : > { %s2562_s10 = sshll.u32 (!%p255_p10), %s2915_s21, 11 }
  0x16   : > { %s3024_s7 = scalar_select %p315_p11, %s2915_s21, 1  ;;  %vm841_vm0 = vcmask 1042432   ;;  %vm842_vm1 = vcmask 1046532   ;;  %vm406_vm2 = vsmask.f32 3328  ;;  %vm1782_vm6 = vcmask 1041408  }
  0x17   : > { %vm407_vm3 = vsmask.f32 7440  ;;  %vm3054_vm4 = vmor %vm841_vm0, %vm842_vm1  ;;  %vm1442_vm7 = vcmask 31744   ;;  %vm1491_vm8 = vcmask 64512   ;;  %vm1524_vm9 = vcmask 97280  }
  0x18   : > { %s2723_s8 = smul.u32 216, %s3024_s7  ;;  %vm3089_vm5 = vmor %vm406_vm2, %vm407_vm3  ;;  %vm1557_vm10 = vcmask 130048   ;;  %vm1590_vm11 = vcmask 162816   ;;  %vm1623_vm12 = vcmask 195584   ;;  %vm1656_vm13 = vcmask 228352   ;;  %s4002_s7 = scalar_lea.hbm %s4078_s4, %s2562_s10 }
  0x19   : > { %vm1689_vm14 = vcmask 261120   ;;  %vm1749_vm15 = vcmask 293888  }
  0x1a   : > { %s3032_s11 = scalar_lea.vmem %s4074_s0, %s2723_s8 }
  0x1b   : > { %v3035_v0 = vld [vmem:[%s3032_s11 + $0x18] sm:$0xf]  ;;  %v3038_v1 = vld [vmem:[%s3032_s11 + $0x1c] sm:$0xf]  ;;  %v355_v2 = vld [vmem:[%s3032_s11 + $0xc] sm:$0xf] }
  0x1c   : > { %v471_v3 = vshrl.u32 %v3038_v1, 16  ;;  %v3044_v4 = vcombine.low %v3035_v0, %v3038_v1  ;;  %v458_v5 = vshrl.u32 %v3035_v0, 16  ;;  %v461_v6 = vshll.u32 %v3035_v0, 16  ;;  %v356_v7 = vld [vmem:[%s3032_s11 + $0x10] sm:$0xf] }
  0x1d   : > { %v443_v8 = vshll.u32 %v356_v7, 16  ;;  %v447_v9 = vshrl.u32 %v356_v7, 16  ;;  %v3049_v10 = vcombine.low %v355_v2, %v356_v7  ;;  %v434_v11 = vshrl.u32 %v355_v2, 16  ;;  %v357_v12 = vld [vmem:[%s3032_s11 + $0x14] sm:$0x1] }
  0x1e   : > { %1237 = vrot.lane.b32.xlu1 %v3044_v4, %s2925_s12  ;;  %v437_v14 = vshll.u32 %v355_v2, 16  ;;  %v2398_v15 = vrot.slane %v355_v2, 9  ;;  %v853_v16 = vrot.slane %v356_v7, 5  ;;  %v856_v17 = vrot.slane %v357_v12, 5  ;;  %v3061_v18 = vld [vmem:[%s3032_s11] sm:$0xf] }
  0x1f   : > { %v449_v19 = vrot.slane %v447_v9, 4  ;;  %1235 = vrot.lane.b32.xlu0 %v3049_v10, %s2925_s12  ;;  %v436_v20 = vrot.slane %v434_v11, 4  ;;  %v3066_v21 = vld [vmem:[%s3032_s11 + $0x4] sm:$0xf]  ;;  %v354_v22 = vld [vmem:[%s3032_s11 + $0x8] sm:$0x1] }
  0x20   : > { %v439_v23 = vrot.slane %v437_v14, 5  ;;  %v854_v24 = vsel %vm3054_vm4, %v2398_v15, %v853_v16  ;;  %v855_v25 = vrot.slane %v853_v16, 4  ;;  %v2397_v26 = vrot.slane %v3061_v18, 9  ;;  %v360_v35 = vld [vmem:[%s3032_s11 + $0x20] sm:$0x1] }
  0x21   : > { %v846_v27 = vrot.slane %v3066_v21, 5  ;;  %v849_v28 = vrot.slane %v354_v22, 5  ;;  %v410_v29 = vshrl.u32 %v3061_v18, 16  ;;  %v413_v30 = vshll.u32 %v3061_v18, 16  ;;  %v3103_v7 = vld [vmem:[%s3032_s11 + $0x24] sm:$0xf] }
  0x22   : > { %v857_v31 = vsel %vm3054_vm4, %v855_v25, %v856_v17  ;;  %v419_v32 = vshll.u32 %v3066_v21, 16  ;;  %v423_v33 = vshrl.u32 %v3066_v21, 16  ;;  %v429_v34 = vshll.u32 %v354_v22, 16 }
  0x23   : > { %v2448_v36 = vcombine.low %v854_v24, %v857_v31  ;;  %v847_v37 = vsel %vm3054_vm4, %v2397_v26, %v846_v27  ;;  %v848_v38 = vrot.slane %v846_v27, 4  ;;  %v412_v39 = vrot.slane %v410_v29, 4  ;;  %v363_v26 = vld [vmem:[%s3032_s11 + $0x2c] sm:$0x1] }
  0x24   : > { %v415_v40 = vrot.slane %v413_v30, 5  ;;  %v421_v41 = vrot.slane %v419_v32, 5  ;;  %v425_v42 = vrot.slane %v423_v33, 4  ;;  %v431_v43 = vrot.slane %v429_v34, 5 }
  0x25   : > { %1305 = vrot.lane.b32.xlu0 %v2448_v36, %s2926_s13  ;;  %v850_v44 = vsel %vm3054_vm4, %v848_v38, %v849_v28  ;;  %v2399_v45 = vrot.slane %v3035_v0, 9  ;;  %v860_v46 = vrot.slane %v3038_v1, 5  ;;  %v863_v47 = vrot.slane %v360_v35, 5 }
  0x26   : > { %v2447_v48 = vcombine.low %v847_v37, %v850_v44  ;;  %v416_v49 = vor.u32 %v415_v40, %v412_v39  ;;  %v426_v50 = vor.u32 %v425_v42, %v421_v41  ;;  %v440_v51 = vor.u32 %v439_v23, %v436_v20 }
  0x27   : > { %v861_v53 = vsel %vm3054_vm4, %v2399_v45, %v860_v46  ;;  %v862_v54 = vrot.slane %v860_v46, 4  ;;  %v445_v55 = vrot.slane %v443_v8, 5  ;;  %v453_v56 = vshll.u32 %v357_v12, 16  ;;  %v362_v12 = vld [vmem:[%s3032_s11 + $0x28] sm:$0xf] }
  0x28   : > { %1200 = vrot.lane.b32.xlu1 %v2447_v48, %s2927_s14  ;;  %v417_v57 = vrot.slane %v416_v49, 4  ;;  %v427_v58 = vrot.slane %v426_v50, 4  ;;  %v441_v59 = vrot.slane %v440_v51, 4  ;;  %v460_v60 = vrot.slane %v458_v5, 4  ;;  %v365_v48 = vld [vmem:[%s3032_s11 + $0x34] sm:$0xf] }
  0x29   : > { %v864_v61 = vsel %vm3054_vm4, %v862_v54, %v863_v47  ;;  %v450_v62 = vor.u32 %v449_v19, %v445_v55  ;;  %v455_v63 = vrot.slane %v453_v56, 5  ;;  %v463_v2 = vrot.slane %v461_v6, 5  ;;  %v364_v47 = vld [vmem:[%s3032_s11 + $0x30] sm:$0xf] }
  0x2a   : > { %v422_v8 = vsel %vm3089_vm5, %v417_v57, %v421_v41  ;;  %v432_v9 = vsel %vm3089_vm5, %v427_v58, %v431_v43  ;;  %v3109_v11 = vcombine.low %v861_v53, %v864_v61  ;;  %v446_v5 = vsel %vm3089_vm5, %v441_v59, %v445_v55 }
  0x2b   : > { %v2431_v14 = vcombine.low %v422_v8, %v432_v9  ;;  %v451_v15 = vrot.slane %v450_v62, 4  ;;  %v464_v16 = vor.u32 %v463_v2, %v460_v60  ;;  %v467_v0 = vshll.u32 %v3038_v1, 16  ;;  %v366_v60 = vld [vmem:[%s3032_s11 + $0x38] sm:$0x1] }
  0x2c   : > { %1202 = vrot.lane.b32.xlu1 %v2448_v36, %s2927_s14  ;;  %v473_v6 = vrot.slane %v471_v3, 4  ;;  %v477_v17 = vshll.u32 %v360_v35, 16  ;;  %v482_v19 = vshrl.u32 %v3103_v7, 16  ;;  %v485_v20 = vshll.u32 %v3103_v7, 16 }
  0x2d   : > { %1120 = vrot.lane.b32.xlu0 %v2431_v14, %s2928_s15  ;;  %v456_v22 = vsel %vm3089_vm5, %v451_v15, %v455_v63  ;;  %v465_v23 = vrot.slane %v464_v16, 4  ;;  %v469_v24 = vrot.slane %v467_v0, 5  ;;  %v495_v25 = vshrl.u32 %v362_v12, 16  ;;  %v3161_v14 = vld [vmem:[%s3032_s11 + $0x40] sm:$0xf] }
  0x2e   : > { %v2432_v27 = vcombine.low %v446_v5, %v456_v22  ;;  %v484_v28 = vrot.slane %v482_v19, 4  ;;  %v479_v1 = vrot.slane %v477_v17, 5  ;;  %v487_v3 = vrot.slane %v485_v20, 5 }
  0x2f   : > { %v474_v29 = vor.u32 %v473_v6, %v469_v24  ;;  %v491_v30 = vshll.u32 %v362_v12, 16  ;;  %v497_v31 = vrot.slane %v495_v25, 4  ;;  %v501_v32 = vshll.u32 %v363_v26, 16 }
  0x30   : > { %1307 = vrot.lane.b32.xlu1 %v3109_v11, %s2926_s13  ;;  %v470_v33 = vsel %vm3089_vm5, %v465_v23, %v469_v24  ;;  %v488_v35 = vor.u32 %v487_v3, %v484_v28  ;;  %v3134_v43 = vcombine.low %v3103_v7, %v362_v12  ;;  %v867_v44 = vrot.slane %v362_v12, 5  ;;  %v3158_v12 = vld [vmem:[%s3032_s11 + $0x3c] sm:$0xf] }
  0x31   : > { %1122 = vrot.lane.b32.xlu0 %v2432_v27, %s2928_s15  ;;  %v475_v34 = vrot.slane %v474_v29, 4  ;;  %v493_v36 = vrot.slane %v491_v30, 5  ;;  %v503_v40 = vrot.slane %v501_v32, 5  ;;  %v2400_v50 = vrot.slane %v3103_v7, 9 }
  0x32   : > { %v489_v38 = vrot.slane %v488_v35, 4  ;;  %v869_v51 = vrot.slane %v867_v44, 4  ;;  %v870_v53 = vrot.slane %v363_v26, 5  ;;  %v506_v54 = vshrl.u32 %v364_v47, 16 }
  0x33   : > { %v480_v37 = vsel %vm3089_vm5, %v475_v34, %v479_v1  ;;  %v498_v39 = vor.u32 %v497_v31, %v493_v36  ;;  %v509_v55 = vshll.u32 %v364_v47, 16  ;;  %v519_v56 = vshrl.u32 %v365_v48, 16  ;;  %v369_v31 = vld [vmem:[%s3032_s11 + $0x44] sm:$0x1] }
  0x34   : > { %v2433_v41 = vcombine.low %v470_v33, %v480_v37  ;;  %v494_v45 = vsel %vm3089_vm5, %v489_v38, %v493_v36  ;;  %v515_v57 = vshll.u32 %v365_v48, 16  ;;  %v868_v58 = vsel %vm3054_vm4, %v2400_v50, %v867_v44 }
  0x35   : > { %1270 = vrot.lane.b32.xlu0 %v2432_v27, %s2929_s16  ;;  %v499_v42 = vrot.slane %v498_v39, 4  ;;  %v871_v59 = vsel %vm3054_vm4, %v869_v51, %v870_v53  ;;  %v508_v61 = vrot.slane %v506_v54, 4  ;;  %v511_v62 = vrot.slane %v509_v55, 5 }
  0x36   : > { %1272 = vrot.lane.b32.xlu1 %v2433_v41, %s2929_s16  ;;  %v517_v63 = vrot.slane %v515_v57, 5  ;;  %v521_v2 = vrot.slane %v519_v56, 4  ;;  %v2450_v7 = vcombine.low %v868_v58, %v871_v59  ;;  %v525_v8 = vshll.u32 %v366_v60, 16  ;;  %v2808_v59 = vld [vmem:[%s4076_s2 + $0x8] sm:$0xff]  }
  0x37   : > { %v504_v46 = vsel %vm3089_vm5, %v499_v42, %v503_v40  ;;  %v512_v9 = vor.u32 %v511_v62, %v508_v61  ;;  %v874_v16 = vrot.slane %v365_v48, 5  ;;  %v530_v0 = vshrl.u32 %v3158_v12, 16 }
  0x38   : > { %v2434_v49 = vcombine.low %v494_v45, %v504_v46  ;;  %v522_v5 = vor.u32 %v521_v2, %v517_v63  ;;  %v527_v15 = vrot.slane %v525_v8, 5  ;;  %v533_v6 = vshll.u32 %v3158_v12, 16 }
  0x39   : > { %1340 = vrot.lane.b32.xlu0 %v3044_v4, %s2930_s17  ;;  %v513_v17 = vrot.slane %v512_v9, 4  ;;  %v543_v20 = vshrl.u32 %v3161_v14, 16  ;;  %v539_v22 = vshll.u32 %v3161_v14, 16  ;;  %v3171_v23 = vcombine.low %v364_v47, %v365_v48  ;;  %v3209_v48 = vld [vmem:[%s3032_s11 + $0x4c] sm:$0xf] }
  0x3a   : > { %1342 = vrot.lane.b32.xlu1 %v3134_v43, %s2930_s17  ;;  %v523_v19 = vrot.slane %v522_v5, 4  ;;  %v2401_v24 = vrot.slane %v364_v47, 9  ;;  %v876_v25 = vrot.slane %v874_v16, 4  ;;  %v877_v26 = vrot.slane %v366_v60, 5  ;;  %v3206_v47 = vld [vmem:[%s3032_s11 + $0x48] sm:$0xf] }
  0x3b   : > { %v532_v27 = vrot.slane %v530_v0, 4  ;;  %v535_v28 = vrot.slane %v533_v6, 5  ;;  %v518_v29 = vsel %vm3089_vm5, %v513_v17, %v517_v63  ;;  %v541_v3 = vrot.slane %v539_v22, 5  ;;  %v372_v63 = vld [vmem:[%s3032_s11 + $0x50] sm:$0x1]  ;;  %v2809_v5 = vld [vmem:[%s4076_s2] sm:$0xff]  }
  0x3c   : > { %v528_v1 = vsel %vm3089_vm5, %v523_v19, %v527_v15  ;;  %v545_v30 = vrot.slane %v543_v20, 4  ;;  %v875_v32 = vsel %vm3054_vm4, %v2401_v24, %v874_v16  ;;  %v878_v33 = vsel %vm3054_vm4, %v876_v25, %v877_v26  ;;  %v3243_v0 = vld [vmem:[%s3032_s11 + $0x54] sm:$0xf]  ;;  %v3246_v6 = vld [vmem:[%s3032_s11 + $0x58] sm:$0xf] }
  0x3d   : > { %1375 = vrot.lane.b32.xlu0 %v2433_v41, %s2931_s24  ;;  %v536_v34 = vor.u32 %v535_v28, %v532_v27  ;;  %v549_v36 = vshll.u32 %v369_v31, 16  ;;  %v3189_v37 = vcombine.low %v875_v32, %v878_v33  ;;  %v881_v42 = vrot.slane %v3161_v14, 5 }
  0x3e   : > { %1377 = vrot.lane.b32.xlu1 %v2434_v49, %s2931_s24  ;;  %v546_v35 = vor.u32 %v545_v30, %v541_v3  ;;  %v2415_v44 = vcombine.low %v3061_v18, %v3066_v21  ;;  %v2402_v50 = vrot.slane %v3158_v12, 9  ;;  %v884_v54 = vrot.slane %v369_v31, 5 }
  0x3f   : > { %v537_v38 = vrot.slane %v536_v34, 4  ;;  %v551_v40 = vrot.slane %v549_v36, 5  ;;  %v883_v53 = vrot.slane %v881_v42, 4  ;;  %v554_v55 = vshrl.u32 %v3206_v47, 16 }
  0x40   : > { %v547_v39 = vrot.slane %v546_v35, 4  ;;  %v557_v56 = vshll.u32 %v3206_v47, 16  ;;  %v567_v57 = vshrl.u32 %v3209_v48, 16  ;;  %v563_v58 = vshll.u32 %v3209_v48, 16  ;;  %v375_v35 = vld [vmem:[%s3032_s11 + $0x5c] sm:$0x1] }
  0x41   : > { %1410 = vrot.lane.b32.xlu0 %v3109_v11, %s2932_s25  ;;  %v542_v45 = vsel %vm3089_vm5, %v537_v38, %v541_v3  ;;  %v882_v61 = vsel %vm3054_vm4, %v2402_v50, %v881_v42  ;;  %v885_v62 = vsel %vm3054_vm4, %v883_v53, %v884_v54  ;;  %v556_v2 = vrot.slane %v554_v55, 4  ;;  %v376_v54 = vld [vmem:[%s3032_s11 + $0x60] sm:$0xf]  ;;  %v377_v55 = vld [vmem:[%s3032_s11 + $0x64] sm:$0xf] }
  0x42   : > { %1124 = vrot.lane.b32.xlu1 %v2433_v41, %s2928_s15  ;;  %v3196_v41 = vcombine.low %v3158_v12, %v3161_v14  ;;  %v552_v46 = vsel %vm3089_vm5, %v547_v39, %v551_v40  ;;  %v565_v8 = vrot.slane %v563_v58, 5  ;;  %v569_v9 = vrot.slane %v567_v57, 4 }
  0x43   : > { %v3219_v51 = vcombine.low %v542_v45, %v552_v46  ;;  %v2452_v12 = vcombine.low %v882_v61, %v885_v62  ;;  %v573_v14 = vshll.u32 %v372_v63, 16  ;;  %v888_v19 = vrot.slane %v3209_v48, 5 }
  0x44   : > { %v570_v16 = vor.u32 %v569_v9, %v565_v8  ;;  %v578_v20 = vshrl.u32 %v3243_v0, 16  ;;  %v581_v22 = vshll.u32 %v3243_v0, 16  ;;  %v591_v26 = vshrl.u32 %v3246_v6, 16 }
  0x45   : > { %1412 = vrot.lane.b32.xlu0 %v2450_v7, %s2932_s25  ;;  %v575_v17 = vrot.slane %v573_v14, 5  ;;  %v587_v27 = vshll.u32 %v3246_v6, 16  ;;  %v3260_v28 = vcombine.low %v3206_v47, %v3209_v48  ;;  %v891_v3 = vrot.slane %v372_v63, 5 }
  0x46   : > { %1126 = vrot.lane.b32.xlu1 %v2434_v49, %s2928_s15  ;;  %v571_v25 = vrot.slane %v570_v16, 4  ;;  %v580_v30 = vrot.slane %v578_v20, 4  ;;  %v583_v31 = vrot.slane %v581_v22, 5  ;;  %v593_v34 = vrot.slane %v591_v26, 4 }
  0x47   : > { %v589_v33 = vrot.slane %v587_v27, 5  ;;  %v597_v42 = vshll.u32 %v375_v35, 16  ;;  %v895_v50 = vrot.slane %v3246_v6, 5  ;;  %v898_v57 = vrot.slane %v375_v35, 5 }
  0x48   : > { %v576_v32 = vsel %vm3089_vm5, %v571_v25, %v575_v17  ;;  %v584_v39 = vor.u32 %v583_v31, %v580_v30  ;;  %v605_v61 = vshll.u32 %v376_v54, 16  ;;  %v615_v62 = vshrl.u32 %v377_v55, 16  ;;  %v3308_v17 = vld [vmem:[%s3032_s11 + $0x6c] sm:$0xf] }
  0x49   : > { %1204 = vrot.lane.b32.xlu0 %v3109_v11, %s2927_s14  ;;  %v2435_v11 = vcombine.low %v518_v29, %v528_v1  ;;  %v2403_v29 = vrot.slane %v3206_v47, 9  ;;  %v890_v1 = vrot.slane %v888_v19, 4  ;;  %v594_v40 = vor.u32 %v593_v34, %v589_v33 }
  0x4a   : > { %1206 = vrot.lane.b32.xlu1 %v2450_v7, %s2927_s14  ;;  %v585_v46 = vrot.slane %v584_v39, 4  ;;  %v599_v48 = vrot.slane %v597_v42, 5  ;;  %v611_v63 = vshll.u32 %v377_v55, 16  ;;  %v607_v9 = vrot.slane %v605_v61, 5  ;;  %v3360_v61 = vld [vmem:[%s3032_s11 + $0x7c] sm:$0xf] }
  0x4b   : > { %v892_v38 = vsel %vm3054_vm4, %v890_v1, %v891_v3  ;;  %v595_v47 = vrot.slane %v594_v40, 4  ;;  %v617_v14 = vrot.slane %v615_v62, 4  ;;  %v626_v25 = vshrl.u32 %v3308_v17, 16 }
  0x4c   : > { %v590_v53 = vsel %vm3089_vm5, %v585_v46, %v589_v33  ;;  %v629_v27 = vshll.u32 %v3308_v17, 16  ;;  %v3320_v3 = vcombine.low %v376_v54, %v377_v55  ;;  %v2405_v30 = vrot.slane %v376_v54, 9 }
  0x4d   : > { %1239 = vrot.lane.b32.xlu0 %v3134_v43, %s2925_s12  ;;  %v628_v33 = vrot.slane %v626_v25, 4 }
  0x4e   : > { %1241 = vrot.lane.b32.xlu1 %v3171_v23, %s2925_s12  ;;  %v631_v35 = vrot.slane %v629_v27, 5 }
  0x51   : > { %1274 = vrot.lane.b32.xlu0 %v2434_v49, %s2929_s16  ;;  %v2806_v49 = vld [vmem:[%s4076_s2 + $0x10] ss:$0 sps:$4 sm:$0x33]  }
  0x52   : > { %1276 = vrot.lane.b32.xlu1 %v2435_v11, %s2929_s16  ;;  %2721 = vmatprep.subr.msk.bf16.mxu0 %vm1782_vm6, %v2806_v49  ;;  %v1784_v60 = vsel %vm1782_vm6, %v2806_v49, 0 }
  0x53   : > { %2722 = vmatprep.subr.msk.bf16.mxu1 %vm1782_vm6, %v2806_v49  ;;  %2678 = vmatpush3.bf16.msra.mxu0 %v1784_v60  ;;  %v3284_v49 = vcombine.low %v3243_v0, %v3246_v6 }
  0x54   : > { %2679 = vmatprep.subr.bf16.mxu0 %v2808_v59  ;;  %2718 = vmatpush3.bf16.msra.mxu1 %v1784_v60  ;;  %v602_v60 = vshrl.u32 %v376_v54, 16 }
  0x55   : > { %1309 = vrot.lane.b32.xlu0 %v2450_v7, %s2926_s13  ;;  %v559_v7 = vrot.slane %v557_v56, 5  ;;  %2716 = vmatprep.subr.bf16.mxu1 %v2808_v59  ;;  %v2404_v56 = vrot.slane %v3243_v0, 9 }
  0x56   : > { %1311 = vrot.lane.b32.xlu1 %v3189_v37, %s2926_s13 }
  0x57   : > { %2680 = vmatpush3.bf16.msra.mxu0 %v2808_v59  ;;  %v560_v15 = vor.u32 %v559_v7, %v556_v2  ;;  %v896_v2 = vsel %vm3054_vm4, %v2404_v56, %v895_v50 }
  0x58   : > { %2681 = vmatprep.subr.bf16.mxu0 %v2809_v5  ;;  %2719 = vmatpush3.bf16.msra.mxu1 %v2808_v59  ;;  %v897_v59 = vrot.slane %v895_v50, 4 }
  0x59   : > { %1344 = vrot.lane.b32.xlu0 %v3171_v23, %s2930_s17  ;;  %2717 = vmatprep.subr.bf16.mxu1 %v2809_v5  ;;  %v561_v24 = vrot.slane %v560_v15, 4 }
  0x5a   : > { %1346 = vrot.lane.b32.xlu1 %v3196_v41, %s2930_s17  ;;  %v899_v7 = vsel %vm3054_vm4, %v897_v59, %v898_v57 }
  0x5b   : > { %2682 = vmatpush3.bf16.msra.mxu0 %v2809_v5  ;;  %v2454_v15 = vcombine.low %v896_v2, %v899_v7 }
  0x5c   : > { %2720 = vmatpush3.bf16.msra.mxu1 %v2809_v5  ;;  %v378_v5 = vld [vmem:[%s3032_s11 + $0x68] sm:$0x1] }
  0x5d   : > { %1379 = vrot.lane.b32.xlu0 %v2435_v11, %s2931_s24  ;;  %v621_v0 = vshll.u32 %v378_v5, 16 }
  0x5e   : > { %1381 = vrot.lane.b32.xlu1 %v3219_v51, %s2931_s24 }
  0x5f   : > { %v623_v22 = vrot.slane %v621_v0, 5 }
  0x61   : > { %1414 = vrot.lane.b32.xlu0 %v3189_v37, %s2932_s25 }
  0x62   : > { %1128 = vrot.lane.b32.xlu1 %v2435_v11, %s2928_s15  ;;  %v566_v11 = vsel %vm3089_vm5, %v561_v24, %v565_v8  ;;  %v604_v8 = vrot.slane %v602_v60, 4  ;;  %v902_v24 = vrot.slane %v377_v55, 5  ;;  %v3357_v60 = vld [vmem:[%s3032_s11 + $0x78] sm:$0xf] }
  0x63   : > { %v2437_v36 = vcombine.low %v566_v11, %v576_v32  ;;  %v905_v32 = vrot.slane %v378_v5, 5  ;;  %v650_v5 = vshrl.u32 %v3357_v60, 16  ;;  %v3415_v18 = vcombine.low %v3357_v60, %v3360_v61 }
  0x64   : > { %v608_v16 = vor.u32 %v607_v9, %v604_v8  ;;  %v904_v11 = vrot.slane %v902_v24, 4  ;;  %v903_v40 = vsel %vm3054_vm4, %v2405_v30, %v902_v24  ;;  %v2407_v21 = vrot.slane %v3357_v60, 9 }
  0x65   : > { %1416 = vrot.lane.b32.xlu0 %v2452_v12, %s2932_s25 }
  0x66   : > { %1130 = vrot.lane.b32.xlu1 %v3219_v51, %s2928_s15  ;;  %v609_v20 = vrot.slane %v608_v16, 4  ;;  %v906_v42 = vsel %vm3054_vm4, %v904_v11, %v905_v32  ;;  %v3391_v11 = vld [vmem:[%s3032_s11 + $0x84] sm:$0xf]  ;;  %v3394_v32 = vld [vmem:[%s3032_s11 + $0x88] sm:$0xf] }
  0x69   : > { %1208 = vrot.lane.b32.xlu0 %v3189_v37, %s2927_s14  ;;  %v889_v37 = vsel %vm3054_vm4, %v2403_v29, %v888_v19  ;;  %v3311_v19 = vld [vmem:[%s3032_s11 + $0x70] sm:$0xf] }
  0x6a   : > { %1210 = vrot.lane.b32.xlu1 %v2452_v12, %s2927_s14  ;;  %v2453_v45 = vcombine.low %v889_v37, %v892_v38  ;;  %v639_v29 = vshrl.u32 %v3311_v19, 16  ;;  %v635_v1 = vshll.u32 %v3311_v19, 16  ;;  %v381_v38 = vld [vmem:[%s3032_s11 + $0x74] sm:$0x1]  ;;  %v3349_v56 = vcombine.low %v3308_v17, %v3311_v19 }
  0x6b   : > { %v909_v57 = vrot.slane %v3311_v19, 5  ;;  %v912_v2 = vrot.slane %v381_v38, 5 }
  0x6c   : > { %v641_v37 = vrot.slane %v639_v29, 4 }
  0x6d   : > { %1243 = vrot.lane.b32.xlu0 %v3196_v41, %s2925_s12  ;;  %v911_v9 = vrot.slane %v909_v57, 4 }
  0x6e   : > { %1245 = vrot.lane.b32.xlu1 %v3260_v28, %s2925_s12 }
  0x71   : > { %1278 = vrot.lane.b32.xlu0 %v3219_v51, %s2929_s16  ;;  %v600_v51 = vsel %vm3089_vm5, %v595_v47, %v599_v48  ;;  %v645_v47 = vshll.u32 %v381_v38, 16  ;;  %v3338_v48 = vcombine.low %v903_v40, %v906_v42  ;;  %v687_v42 = vshrl.u32 %v3394_v32, 16 }
  0x72   : > { %1280 = vrot.lane.b32.xlu1 %v2437_v36, %s2929_s16  ;;  %v2438_v58 = vcombine.low %v590_v53, %v600_v51 }
  0x73   : > { %v647_v54 = vrot.slane %v645_v47, 5 }
  0x75   : > { %1313 = vrot.lane.b32.xlu0 %v2452_v12, %s2926_s13  ;;  %v613_v12 = vrot.slane %v611_v63, 5  ;;  %v2406_v63 = vrot.slane %v3308_v17, 9  ;;  %v652_v17 = vrot.slane %v650_v5, 4 }
  0x76   : > { %1315 = vrot.lane.b32.xlu1 %v2453_v45, %s2926_s13 }
  0x77   : > { %v618_v6 = vor.u32 %v617_v14, %v613_v12  ;;  %v614_v31 = vsel %vm3089_vm5, %v609_v20, %v613_v12  ;;  %v653_v12 = vshll.u32 %v3357_v60, 16  ;;  %v663_v14 = vshrl.u32 %v3360_v61, 16 }
  0x78   : > { %v910_v0 = vsel %vm3054_vm4, %v2406_v63, %v909_v57 }
  0x79   : > { %1348 = vrot.lane.b32.xlu0 %v3260_v28, %s2930_s17  ;;  %v619_v26 = vrot.slane %v618_v6, 4  ;;  %v913_v6 = vsel %vm3054_vm4, %v911_v9, %v912_v2  ;;  %v655_v19 = vrot.slane %v653_v12, 5  ;;  %v665_v25 = vrot.slane %v663_v14, 4  ;;  %v3427_v2 = vld [vmem:[%s3032_s11 + $0x8c] sm:$0x1] }
  0x7a   : > { %1350 = vrot.lane.b32.xlu1 %v3284_v49, %s2930_s17 }
  0x7b   : > { %v624_v34 = vsel %vm3089_vm5, %v619_v26, %v623_v22  ;;  %v384_v22 = vld [vmem:[%s3032_s11 + $0x80] sm:$0x1]  ;;  %v3385_v26 = vcombine.low %v910_v0, %v913_v6  ;;  %v656_v29 = vor.u32 %v655_v19, %v652_v17  ;;  %v693_v6 = vshll.u32 %v3427_v2, 16 }
  0x7c   : > { %v2439_v39 = vcombine.low %v614_v31, %v624_v34 }
  0x7d   : > { %1383 = vrot.lane.b32.xlu0 %v2437_v36, %s2931_s24  ;;  %v657_v34 = vrot.slane %v656_v29, 4 }
  0x7e   : > { %1385 = vrot.lane.b32.xlu1 %v2438_v58, %s2931_s24 }
  0x81   : > { %1418 = vrot.lane.b32.xlu0 %v2453_v45, %s2932_s25 }
  0x82   : > { %1132 = vrot.lane.b32.xlu1 %v2437_v36, %s2928_s15  ;;  %v637_v36 = vrot.slane %v635_v1, 5  ;;  %v669_v1 = vshll.u32 %v384_v22, 16 }
  0x84   : > { %v642_v46 = vor.u32 %v641_v37, %v637_v36  ;;  %v677_v37 = vshll.u32 %v3391_v11, 16 }
  0x85   : > { %1420 = vrot.lane.b32.xlu0 %v2454_v15, %s2932_s25 }
  0x86   : > { %1134 = vrot.lane.b32.xlu1 %v2438_v58, %s2928_s15  ;;  %v643_v51 = vrot.slane %v642_v46, 4 }
  0x88   : > { %v648_v59 = vsel %vm3089_vm5, %v643_v51, %v647_v54 }
  0x89   : > { %1212 = vrot.lane.b32.xlu0 %v2453_v45, %s2927_s14  ;;  %v632_v45 = vor.u32 %v631_v35, %v628_v33  ;;  %v916_v33 = vrot.slane %v3360_v61, 5  ;;  %v671_v35 = vrot.slane %v669_v1, 5  ;;  %v695_v1 = vrot.slane %v693_v6, 5 }
  0x8a   : > { %1214 = vrot.lane.b32.xlu1 %v2454_v15, %s2927_s14 }
  0x8b   : > { %v633_v53 = vrot.slane %v632_v45, 4  ;;  %v683_v45 = vshll.u32 %v3394_v32, 16  ;;  %v917_v12 = vsel %vm3054_vm4, %v2407_v21, %v916_v33 }
  0x8d   : > { %1247 = vrot.lane.b32.xlu0 %v3284_v49, %s2925_s12 }
  0x8e   : > { %1249 = vrot.lane.b32.xlu1 %v3320_v3, %s2925_s12 }
  0x90   : > { %v3342_v55 = vpop.permute.xlu1 %1237 }
  0x91   : > { %1282 = vrot.lane.b32.xlu0 %v2438_v58, %s2929_s16  ;;  %v3340_v50 = vpop.permute.xlu0 %1235  ;;  %v638_v58 = vsel %vm3089_vm5, %v633_v53, %v637_v36  ;;  %v674_v36 = vshrl.u32 %v3391_v11, 16 }
  0x92   : > { %1284 = vrot.lane.b32.xlu1 %v2439_v39, %s2929_s16  ;;  %v3369_v8 = vcombine.low %v638_v58, %v648_v59  ;;  %v679_v58 = vrot.slane %v677_v37, 5  ;;  %v685_v59 = vrot.slane %v683_v45, 5  ;;  %v926_v45 = vrot.slane %v3427_v2, 5 }
  0x93   : > { %v676_v54 = vrot.slane %v674_v36, 4 }
  0x95   : > { %1317 = vrot.lane.b32.xlu0 %v2454_v15, %s2926_s13  ;;  %v659_v15 = vshll.u32 %v3360_v61, 16  ;;  %v689_v61 = vrot.slane %v687_v42, 4  ;;  %v3484_v42 = vld [vmem:[%s3032_s11 + $0x94] sm:$0xf] }
  0x96   : > { %1319 = vrot.lane.b32.xlu1 %v3338_v48, %s2926_s13 }
  0x97   : > { %v3364_v62 = vpop.permute.xlu0 %1305  ;;  %v661_v24 = vrot.slane %v659_v15, 5  ;;  %v690_v0 = vor.u32 %v689_v61, %v685_v59  ;;  %v390_v61 = vld [vmem:[%s3032_s11 + $0x98] sm:$0x1] }
  0x99   : > { %1352 = vrot.lane.b32.xlu0 %v3320_v3, %s2930_s17  ;;  %v666_v31 = vor.u32 %v665_v25, %v661_v24  ;;  %v662_v51 = vsel %vm3089_vm5, %v657_v34, %v661_v24  ;;  %v3469_v34 = vcombine.low %v3391_v11, %v3394_v32 }
  0x9a   : > { %1354 = vrot.lane.b32.xlu1 %v3349_v56, %s2930_s17  ;;  %v1201_v7 = vpop.permute.xlu1 %1200 }
  0x9b   : > { %v667_v40 = vrot.slane %v666_v31, 4 }
  0x9d   : > { %1387 = vrot.lane.b32.xlu0 %v2439_v39, %s2931_s24 }
  0x9e   : > { %1389 = vrot.lane.b32.xlu1 %v3369_v8, %s2931_s24  ;;  %v1203_v16 = vpop.permute.xlu1 %1202 }
  0x9f   : > { %v1121_v20 = vpop.permute.xlu0 %1120 }
  0xa0   : > { %v1445_v38 = vsel %vm1442_vm7, %v2415_v44, %v1121_v20  ;;  %v919_v44 = vrot.slane %v384_v22, 5 }
  0xa1   : > { %1422 = vrot.lane.b32.xlu0 %v3338_v48, %s2932_s25  ;;  %v1493_v53 = vsel %vm1491_vm8, %v1445_v38, %v1201_v7  ;;  %v3478_v38 = vld [vmem:[%s3032_s11 + $0x90] sm:$0xf] }
  0xa2   : > { %1136 = vrot.lane.b32.xlu1 %v2439_v39, %s2928_s15  ;;  %v3388_v27 = vpop.permute.xlu1 %1307  ;;  %v1526_v7 = vsel %vm1524_vm9, %v1493_v53, %v3340_v50  ;;  %v698_v21 = vshrl.u32 %v3478_v38, 16 }
  0xa3   : > { %v1123_v30 = vpop.permute.xlu0 %1122 }
  0xa4   : > { %v1448_v47 = vsel %vm1442_vm7, %v3049_v10, %v1123_v30  ;;  %v918_v10 = vrot.slane %v916_v33, 4 }
  0xa5   : > { %1424 = vrot.lane.b32.xlu0 %v3385_v26, %s2932_s25  ;;  %v1495_v60 = vsel %vm1491_vm8, %v1448_v47, %v1203_v16  ;;  %v680_v16 = vor.u32 %v679_v58, %v676_v54 }
  0xa6   : > { %1138 = vrot.lane.b32.xlu1 %v3369_v8, %s2928_s15  ;;  %v920_v14 = vsel %vm3054_vm4, %v918_v10, %v919_v44  ;;  %v1528_v50 = vsel %vm1524_vm9, %v1495_v60, %v3342_v55  ;;  %v701_v44 = vshll.u32 %v3478_v38, 16  ;;  %v707_v10 = vshll.u32 %v3484_v42, 16 }
  0xa7   : > { %v1271_v39 = vpop.permute.xlu0 %1270  ;;  %v3453_v55 = vcombine.low %v917_v12, %v920_v14  ;;  %v681_v29 = vrot.slane %v680_v16, 4  ;;  %v717_v12 = vshll.u32 %v390_v61, 16 }
  0xa8   : > { %v1273_v46 = vpop.permute.xlu1 %1272  ;;  %v1559_v9 = vsel %vm1557_vm10, %v1526_v7, %v1271_v39  ;;  %v703_v58 = vrot.slane %v701_v44, 5  ;;  %v709_v60 = vrot.slane %v707_v10, 5 }
  0xa9   : > { %1216 = vrot.lane.b32.xlu0 %v3338_v48, %s2927_s14  ;;  %v672_v48 = vsel %vm3089_vm5, %v667_v40, %v671_v35  ;;  %v1592_v19 = vsel %vm1590_vm11, %v1559_v9, %v3364_v62  ;;  %v1561_v20 = vsel %vm1557_vm10, %v1528_v50, %v1273_v46  ;;  %v691_v62 = vrot.slane %v690_v0, 4  ;;  %v3520_v0 = vld [vmem:[%s3032_s11 + $0xa0] sm:$0xf] }
  0xaa   : > { %1218 = vrot.lane.b32.xlu1 %v3385_v26, %s2927_s14  ;;  %v3436_v5 = vcombine.low %v662_v51, %v672_v48  ;;  %v1594_v31 = vsel %vm1590_vm11, %v1561_v20, %v3388_v27  ;;  %v923_v35 = vrot.slane %v3394_v32, 5  ;;  %v686_v27 = vsel %vm3089_vm5, %v681_v29, %v685_v59 }
  0xab   : > { %v1341_v57 = vpop.permute.xlu0 %1340  ;;  %v2408_v32 = vrot.slane %v3391_v11, 9  ;;  %v711_v51 = vshrl.u32 %v3484_v42, 16  ;;  %v700_v48 = vrot.slane %v698_v21, 4  ;;  %v731_v29 = vshll.u32 %v3520_v0, 16 }
  0xac   : > { %v1343_v63 = vpop.permute.xlu1 %1342  ;;  %v1625_v22 = vsel %vm1623_vm12, %v1592_v19, %v1341_v57  ;;  %v925_v47 = vrot.slane %v923_v35, 4  ;;  %v930_v19 = vrot.slane %v3484_v42, 5 }
  0xad   : > { %1251 = vrot.lane.b32.xlu0 %v3349_v56, %s2925_s12  ;;  %v1627_v33 = vsel %vm1623_vm12, %v1594_v31, %v1343_v63  ;;  %v924_v11 = vsel %vm3054_vm4, %v2408_v32, %v923_v35  ;;  %v713_v63 = vrot.slane %v711_v51, 4  ;;  %v704_v9 = vor.u32 %v703_v58, %v700_v48 }
  0xae   : > { %1253 = vrot.lane.b32.xlu1 %v3415_v18, %s2925_s12  ;;  %v927_v57 = vsel %vm3054_vm4, %v925_v47, %v926_v45  ;;  %v933_v35 = vrot.slane %v390_v61, 5 }
  0xaf   : > { %v1376_v15 = vpop.permute.xlu0 %1375  ;;  %v3512_v7 = vcombine.low %v924_v11, %v927_v57  ;;  %v714_v50 = vor.u32 %v713_v63, %v709_v60  ;;  %v705_v6 = vrot.slane %v704_v9, 4 }
  0xb0   : > { %v1378_v17 = vpop.permute.xlu1 %1377  ;;  %v1658_v24 = vsel %vm1656_vm13, %v1625_v22, %v1376_v15  ;;  %v3517_v15 = vld [vmem:[%s3032_s11 + $0x9c] sm:$0xf] }
  0xb1   : > { %1286 = vrot.lane.b32.xlu0 %v3369_v8, %s2929_s16  ;;  %v1660_v36 = vsel %vm1656_vm13, %v1627_v33, %v1378_v17  ;;  %v719_v17 = vrot.slane %v717_v12, 5  ;;  %v715_v22 = vrot.slane %v714_v50, 4  ;;  %v710_v31 = vsel %vm3089_vm5, %v705_v6, %v709_v60 }
  0xb2   : > { %1288 = vrot.lane.b32.xlu1 %v3436_v5, %s2929_s16  ;;  %v932_v33 = vrot.slane %v930_v19, 4 }
  0xb3   : > { %v1411_v25 = vpop.permute.xlu0 %1410 }
  0xb4   : > { %v3456_v30 = vpop.permute.xlu1 %1124  ;;  %v1691_v8 = vsel %vm1689_vm14, %v1658_v24, %v1411_v25  ;;  %v725_v24 = vshll.u32 %v3517_v15, 16  ;;  %v735_v25 = vshrl.u32 %v3520_v0, 16 }
  0xb5   : > { %1321 = vrot.lane.b32.xlu0 %v3385_v26, %s2926_s13  ;;  %2683 = vmatprep.mubr.msk.bf16.mxu0 %vm1749_vm15, %v1691_v8  ;;  %v696_v26 = vsel %vm3089_vm5, %v691_v62, %v695_v1  ;;  %v3535_v1 = vcombine.low %v3478_v38, %v3484_v42  ;;  %v2409_v8 = vrot.slane %v3478_v38, 9  ;;  %v1451_v38 = vsel %vm1442_vm7, %v3044_v4, %v3456_v30 }
  0xb6   : > { %1323 = vrot.lane.b32.xlu1 %v3453_v55, %s2926_s13  ;;  %v3493_v46 = vcombine.low %v686_v27, %v696_v26  ;;  %v720_v27 = vsel %vm3089_vm5, %v715_v22, %v719_v17  ;;  %v727_v26 = vrot.slane %v725_v24, 5  ;;  %v737_v42 = vrot.slane %v735_v25, 4  ;;  %v3601_v22 = vld [vmem:[%s3032_s11 + $0xa8] sm:$0xf] }
  0xb7   : > { %v1413_v37 = vpop.permute.xlu0 %1412  ;;  %v3555_v47 = vcombine.low %v710_v31, %v720_v27  ;;  %v931_v21 = vsel %vm3054_vm4, %v2409_v8, %v930_v19  ;;  %v934_v4 = vsel %vm3054_vm4, %v932_v33, %v933_v35  ;;  %v937_v17 = vrot.slane %v3520_v0, 5 }
  0xb8   : > { %v3480_v39 = vpop.permute.xlu1 %1126  ;;  %v1693_v40 = vsel %vm1689_vm14, %v1660_v36, %v1413_v37  ;;  %v3575_v60 = vcombine.low %v931_v21, %v934_v4  ;;  %v746_v33 = vshrl.u32 %v3601_v22, 16  ;;  %v749_v35 = vshll.u32 %v3601_v22, 16 }
  0xb9   : > { %1356 = vrot.lane.b32.xlu0 %v3415_v18, %s2930_s17  ;;  %2684 = vmatmul.mubr.msk.bf16.vlgmr.msra.gmra.mxu0 %vm1749_vm15, %v1693_v40  ;;  %v733_v40 = vrot.slane %v731_v29, 5  ;;  %v1454_v48 = vsel %vm1442_vm7, %v3134_v43, %v3480_v39  ;;  %v3607_v29 = vld [vmem:[%s3032_s11 + $0xac] sm:$0xf]  ;;  %v939_v31 = vrot.slane %v937_v17, 4 }
  0xba   : > { %1358 = vrot.lane.b32.xlu1 %v3469_v34, %s2930_s17  ;;  %v755_v27 = vshll.u32 %v3607_v29, 16 }
  0xbb   : > { %v1205_v53 = vpop.permute.xlu0 %1204  ;;  %v738_v11 = vor.u32 %v737_v42, %v733_v40  ;;  %v751_v42 = vrot.slane %v749_v35, 5 }
  0xbc   : > { %v3499_v54 = vpop.permute.xlu1 %1206  ;;  %v1497_v45 = vsel %vm1491_vm8, %v1451_v38, %v1205_v53  ;;  %v396_v38 = vld [vmem:[%s3032_s11 + $0xb0] sm:$0x1] }
  0xbd   : > { %1391 = vrot.lane.b32.xlu0 %v3436_v5, %s2931_s24  ;;  %v765_v4 = vshll.u32 %v396_v38, 16 }
  0xbe   : > { %1393 = vrot.lane.b32.xlu1 %v3493_v46, %s2931_s24 }
  0xbf   : > { %v1240_v59 = vpop.permute.xlu0 %1239 }
  0xc0   : > { %v1242_v2 = vpop.permute.xlu1 %1241  ;;  %v1530_v51 = vsel %vm1524_vm9, %v1497_v45, %v1240_v59  ;;  %v1499_v59 = vsel %vm1491_vm8, %v1454_v48, %v3499_v54  ;;  %v757_v45 = vrot.slane %v755_v27, 5  ;;  %v3645_v48 = vld [vmem:[%s3032_s11 + $0xb8] sm:$0xf] }
  0xc1   : > { %1426 = vrot.lane.b32.xlu0 %v3453_v55, %s2932_s25  ;;  %v1532_v9 = vsel %vm1524_vm9, %v1499_v59, %v1242_v2  ;;  %v767_v59 = vrot.slane %v765_v4, 5 }
  0xc2   : > { %1140 = vrot.lane.b32.xlu1 %v3436_v5, %s2928_s15  ;;  %v722_v5 = vshrl.u32 %v3517_v15, 16 }
  0xc3   : > { %v1275_v14 = vpop.permute.xlu0 %1274 }
  0xc4   : > { %v1277_v16 = vpop.permute.xlu1 %1276  ;;  %v724_v36 = vrot.slane %v722_v5, 4  ;;  %v1563_v53 = vsel %vm1557_vm10, %v1530_v51, %v1275_v14  ;;  %v739_v14 = vrot.slane %v738_v11, 4 }
  0xc5   : > { %1428 = vrot.lane.b32.xlu0 %v3512_v7, %s2932_s25 }
  0xc6   : > { %1142 = vrot.lane.b32.xlu1 %v3493_v46, %s2928_s15  ;;  %v728_v30 = vor.u32 %v727_v26, %v724_v36 }
  0xc7   : > { %v1310_v20 = vpop.permute.xlu0 %1309 }
  0xc8   : > { %v1312_v62 = vpop.permute.xlu1 %1311  ;;  %v1596_v58 = vsel %vm1590_vm11, %v1563_v53, %v1310_v20  ;;  %v729_v12 = vrot.slane %v728_v30, 4  ;;  %v3642_v53 = vld [vmem:[%s3032_s11 + $0xb4] sm:$0xf] }
  0xc9   : > { %1220 = vrot.lane.b32.xlu0 %v3453_v55, %s2927_s14  ;;  %v3545_v55 = vld [vmem:[%s3032_s11 + $0xa4] sm:$0x1] }
  0xca   : > { %1222 = vrot.lane.b32.xlu1 %v3512_v7, %s2927_s14  ;;  %v741_v44 = vshll.u32 %v3545_v55, 16  ;;  %v734_v20 = vsel %vm3089_vm5, %v729_v12, %v733_v40  ;;  %v748_v40 = vrot.slane %v746_v33, 4  ;;  %v779_v12 = vshll.u32 %v3645_v48, 16 }
  0xcb   : > { %v1345_v37 = vpop.permute.xlu0 %1344 }
  0xcc   : > { %v1347_v32 = vpop.permute.xlu1 %1346  ;;  %v1629_v61 = vsel %vm1623_vm12, %v1596_v58, %v1345_v37  ;;  %v743_v63 = vrot.slane %v741_v44, 5  ;;  %v759_v37 = vshrl.u32 %v3607_v29, 16 }
  0xcd   : > { %1255 = vrot.lane.b32.xlu0 %v3469_v34, %s2925_s12 }
  0xce   : > { %1257 = vrot.lane.b32.xlu1 %v3535_v1, %s2925_s12  ;;  %v761_v21 = vrot.slane %v759_v37, 4 }
  0xcf   : > { %v1380_v10 = vpop.permute.xlu0 %1379 }
  0xd0   : > { %v1382_v57 = vpop.permute.xlu1 %1381  ;;  %v1662_v43 = vsel %vm1656_vm13, %v1629_v61, %v1380_v10  ;;  %v752_v10 = vor.u32 %v751_v42, %v748_v40  ;;  %v762_v11 = vor.u32 %v761_v21, %v757_v45  ;;  %v944_v61 = vrot.slane %v3607_v29, 5 }
  0xd1   : > { %1290 = vrot.lane.b32.xlu0 %v3493_v46, %s2929_s16  ;;  %v1565_v46 = vsel %vm1557_vm10, %v1532_v9, %v1277_v16  ;;  %v3592_v16 = vcombine.low %v3517_v15, %v3520_v0  ;;  %v2410_v0 = vrot.slane %v3517_v15, 9 }
  0xd2   : > { %1292 = vrot.lane.b32.xlu1 %v3555_v47, %s2929_s16  ;;  %v1598_v6 = vsel %vm1590_vm11, %v1565_v46, %v1312_v62  ;;  %v940_v62 = vrot.slane %v3545_v55, 5  ;;  %v753_v58 = vrot.slane %v752_v10, 4  ;;  %v763_v9 = vrot.slane %v762_v11, 4 }
  0xd3   : > { %v1415_v39 = vpop.permute.xlu0 %1414  ;;  %v1631_v2 = vsel %vm1623_vm12, %v1598_v6, %v1347_v32  ;;  %v938_v15 = vsel %vm3054_vm4, %v2410_v0, %v937_v17  ;;  %v3660_v46 = vcombine.low %v3601_v22, %v3607_v29  ;;  %v947_v17 = vrot.slane %v396_v38, 5 }
  0xd4   : > { %v3580_v50 = vpop.permute.xlu1 %1128  ;;  %v1695_v54 = vsel %vm1689_vm14, %v1662_v43, %v1415_v39  ;;  %v1664_v19 = vsel %vm1656_vm13, %v1631_v2, %v1382_v57  ;;  %v941_v55 = vsel %vm3054_vm4, %v939_v31, %v940_v62  ;;  %v773_v43 = vshll.u32 %v3642_v53, 16 }
  0xd5   : > { %1325 = vrot.lane.b32.xlu0 %v3512_v7, %s2926_s13  ;;  %2687 = vmatprep.mubr.msk.bf16.mxu0 %vm1749_vm15, %v1695_v54  ;;  %v744_v7 = vsel %vm3089_vm5, %v739_v14, %v743_v63  ;;  %v3637_v51 = vcombine.low %v938_v15, %v941_v55  ;;  %v783_v39 = vshrl.u32 %v3645_v48, 16  ;;  %v2411_v54 = vrot.slane %v3601_v22, 9 }
  0xd6   : > { %1327 = vrot.lane.b32.xlu1 %v3575_v60, %s2926_s13  ;;  %v3616_v8 = vcombine.low %v734_v20, %v744_v7  ;;  %v758_v6 = vsel %vm3089_vm5, %v753_v58, %v757_v45  ;;  %v946_v2 = vrot.slane %v944_v61, 4  ;;  %v768_v20 = vsel %vm3089_vm5, %v763_v9, %v767_v59 }
  0xd7   : > { %v1417_v5 = vpop.permute.xlu0 %1416  ;;  %v775_v7 = vrot.slane %v773_v43, 5  ;;  %v785_v29 = vrot.slane %v783_v39, 4  ;;  %v1457_v0 = vsel %vm1442_vm7, %v3171_v23, %v3580_v50  ;;  %v3680_v31 = vcombine.low %v758_v6, %v768_v20 }
  0xd8   : > { %v3603_v24 = vpop.permute.xlu1 %1130  ;;  %v1697_v25 = vsel %vm1689_vm14, %v1664_v19, %v1417_v5  ;;  %v945_v33 = vsel %vm3054_vm4, %v2411_v54, %v944_v61  ;;  %v948_v23 = vsel %vm3054_vm4, %v946_v2, %v947_v17  ;;  %v951_v61 = vrot.slane %v3645_v48, 5 }
  0xd9   : > { %1360 = vrot.lane.b32.xlu0 %v3535_v1, %s2930_s17  ;;  %2688 = vmatmul.mubr.msk.bf16.gmra.mxu0 %vm1749_vm15, %v1697_v25  ;;  %v781_v25 = vrot.slane %v779_v12, 5  ;;  %v1460_v40 = vsel %vm1442_vm7, %v3196_v41, %v3603_v24  ;;  %v3702_v45 = vcombine.low %v945_v33, %v948_v23  ;;  %v2412_v17 = vrot.slane %v3642_v53, 9 }
  0xda   : > { %1362 = vrot.lane.b32.xlu1 %v3592_v16, %s2930_s17 }
  0xdb   : > { %v1209_v36 = vpop.permute.xlu0 %1208  ;;  %v786_v15 = vor.u32 %v785_v29, %v781_v25 }
  0xdc   : > { %v3622_v26 = vpop.permute.xlu1 %1210  ;;  %v1501_v62 = vsel %vm1491_vm8, %v1457_v0, %v1209_v36 }
  0xdd   : > { %1395 = vrot.lane.b32.xlu0 %v3555_v47, %s2931_s24  ;;  %v787_v10 = vrot.slane %v786_v15, 4 }
  0xde   : > { %1397 = vrot.lane.b32.xlu1 %v3616_v8, %s2931_s24 }
  0xdf   : > { %v1244_v32 = vpop.permute.xlu0 %1243 }
  0xe0   : > { %v3633_v44 = vpop.permute.xlu1 %1245  ;;  %v1534_v37 = vsel %vm1524_vm9, %v1501_v62, %v1244_v32  ;;  %v1503_v32 = vsel %vm1491_vm8, %v1460_v40, %v3622_v26 }
  0xe1   : > { %1430 = vrot.lane.b32.xlu0 %v3575_v60, %s2932_s25  ;;  %v1536_v41 = vsel %vm1524_vm9, %v1503_v32, %v3633_v44 }
  0xe2   : > { %1144 = vrot.lane.b32.xlu1 %v3555_v47, %s2928_s15  ;;  %v770_v47 = vshrl.u32 %v3642_v53, 16 }
  0xe3   : > { %v1279_v30 = vpop.permute.xlu0 %1278 }
  0xe4   : > { %v1281_v57 = vpop.permute.xlu1 %1280  ;;  %v772_v19 = vrot.slane %v770_v47, 4  ;;  %v1567_v36 = vsel %vm1557_vm10, %v1534_v37, %v1279_v30 }
  0xe5   : > { %1432 = vrot.lane.b32.xlu0 %v3637_v51, %s2932_s25  ;;  %v1569_v4 = vsel %vm1557_vm10, %v1536_v41, %v1281_v57  ;;  %v3728_v57 = vcombine.low %v3642_v53, %v3645_v48  ;;  %v952_v53 = vsel %vm3054_vm4, %v2412_v17, %v951_v61 }
  0xe6   : > { %1146 = vrot.lane.b32.xlu1 %v3616_v8, %s2928_s15  ;;  %v776_v50 = vor.u32 %v775_v7, %v772_v19  ;;  %v953_v19 = vrot.slane %v951_v61, 4 }
  0xe7   : > { %v1314_v63 = vpop.permute.xlu0 %1313 }
  0xe8   : > { %v1316_v14 = vpop.permute.xlu1 %1315  ;;  %v1600_v42 = vsel %vm1590_vm11, %v1567_v36, %v1314_v63  ;;  %v777_v26 = vrot.slane %v776_v50, 4 }
  0xe9   : > { %1224 = vrot.lane.b32.xlu0 %v3575_v60, %s2927_s14  ;;  %v3670_v60 = vld [vmem:[%s3032_s11 + $0xbc] sm:$0x1]  ;;  %s2529_s11 = sadd.s32 192, %s2723_s8  ;;  %v1602_v58 = vsel %vm1590_vm11, %v1569_v4, %v1316_v14 }
  0xea   : > { %1226 = vrot.lane.b32.xlu1 %v3637_v51, %s2927_s14  ;;  %v789_v35 = vshll.u32 %v3670_v60, 16  ;;  %s3707_s9 = scalar_lea.vmem %s4075_s1, %s2529_s11  ;;  %v782_v9 = vsel %vm3089_vm5, %v777_v26, %v781_v25 }
  0xeb   : > { %v1349_v5 = vpop.permute.xlu0 %1348  ;;  %v3721_v44 = vld [vmem:[%s3707_s9] sm:$0xf]  ;;  %v3732_v47 = vld [vmem:[%s3707_s9 + $0x4] sm:$0xf]  ;;  %v402_v62 = vld [vmem:[%s3707_s9 + $0x8] sm:$0x1] }
  0xec   : > { %v1351_v22 = vpop.permute.xlu1 %1350  ;;  %v1633_v38 = vsel %vm1623_vm12, %v1600_v42, %v1349_v5  ;;  %v791_v21 = vrot.slane %v789_v35, 5  ;;  %v957_v14 = vshrl.u32 %v3721_v44, 16  ;;  %v960_v54 = vshll.u32 %v3721_v44, 16  ;;  %v3775_v15 = vld [vmem:[%s3707_s9 + $0xc] sm:$0xf] }
  0xed   : > { %1259 = vrot.lane.b32.xlu0 %v3592_v16, %s2925_s12  ;;  %v1635_v59 = vsel %vm1623_vm12, %v1602_v58, %v1351_v22  ;;  %v970_v48 = vshrl.u32 %v3732_v47, 16  ;;  %v966_v6 = vshll.u32 %v3732_v47, 16  ;;  %v954_v5 = vrot.slane %v3670_v60, 5 }
  0xee   : > { %1261 = vrot.lane.b32.xlu1 %v3660_v46, %s2925_s12  ;;  %v792_v43 = vsel %vm3089_vm5, %v787_v10, %v791_v21  ;;  %v959_v25 = vrot.slane %v957_v14, 4  ;;  %v962_v29 = vrot.slane %v960_v54, 5  ;;  %v976_v50 = vshll.u32 %v402_v62, 16  ;;  %v405_v14 = vld [vmem:[%s3707_s9 + $0x14] sm:$0x1] }
  0xef   : > { %v1384_v27 = vpop.permute.xlu0 %1383  ;;  %v3751_v2 = vcombine.low %v782_v9, %v792_v43  ;;  %v968_v22 = vrot.slane %v966_v6, 5  ;;  %v972_v0 = vrot.slane %v970_v48, 4  ;;  %v955_v60 = vsel %vm3054_vm4, %v953_v19, %v954_v5 }
  0xf0   : > { %v1386_v55 = vpop.permute.xlu1 %1385  ;;  %v1666_v24 = vsel %vm1656_vm13, %v1633_v38, %v1384_v27  ;;  %v963_v37 = vor.u32 %v962_v29, %v959_v25  ;;  %v3770_v27 = vcombine.low %v952_v53, %v955_v60  ;;  %v978_v38 = vrot.slane %v976_v50, 5 }
  0xf1   : > { %1294 = vrot.lane.b32.xlu0 %v3616_v8, %s2929_s16  ;;  %v1668_v63 = vsel %vm1656_vm13, %v1635_v59, %v1386_v55  ;;  %v973_v23 = vor.u32 %v972_v0, %v968_v22  ;;  %v3778_v55 = vld [vmem:[%s3707_s9 + $0x10] sm:$0xf]  ;;  %v991_v21 = vshrl.u32 %v3775_v15, 16  ;;  %v994_v41 = vshll.u32 %v3775_v15, 16 }
  0xf2   : > { %1296 = vrot.lane.b32.xlu1 %v3680_v31, %s2929_s16  ;;  %v964_v42 = vrot.slane %v963_v37, 4  ;;  %v2463_v4 = vcombine.low %v3721_v44, %v3732_v47  ;;  %v2413_v59 = vrot.slane %v3721_v44, 9  ;;  %v988_v9 = vrot.slane %v402_v62, 5 }
  0xf3   : > { %v1419_v8 = vpop.permute.xlu0 %1418  ;;  %v974_v32 = vrot.slane %v973_v23, 4  ;;  %v993_v61 = vrot.slane %v991_v21, 4  ;;  %v1010_v25 = vshll.u32 %v405_v14, 16 }
  0xf4   : > { %v3713_v30 = vpop.permute.xlu1 %1132  ;;  %v1699_v11 = vsel %vm1689_vm14, %v1666_v24, %v1419_v8  ;;  %v1004_v24 = vshrl.u32 %v3778_v55, 16  ;;  %v1000_v8 = vshll.u32 %v3778_v55, 16 }
  0xf5   : > { %1329 = vrot.lane.b32.xlu0 %v3637_v51, %s2926_s13  ;;  %2691 = vmatprep.mubr.msk.bf16.mxu0 %vm1749_vm15, %v1699_v11  ;;  %v969_v11 = vsel %vm3089_vm5, %v964_v42, %v968_v22  ;;  %v979_v58 = vsel %vm3089_vm5, %v974_v32, %v978_v38  ;;  %v1012_v23 = vrot.slane %v1010_v25, 5 }
  0xf6   : > { %1331 = vrot.lane.b32.xlu1 %v3702_v45, %s2926_s13  ;;  %v1002_v43 = vrot.slane %v1000_v8, 5  ;;  %v2464_v44 = vcombine.low %v969_v11, %v979_v58  ;;  %v1022_v8 = vrot.slane %v405_v14, 5 }
  0xf7   : > { %v1421_v51 = vpop.permute.xlu0 %1420 }
  0xf8   : > { %v3739_v39 = vpop.permute.xlu1 %1134  ;;  %v1701_v12 = vsel %vm1689_vm14, %v1668_v63, %v1421_v51  ;;  %v996_v63 = vrot.slane %v994_v41, 5 }
  0xf9   : > { %1364 = vrot.lane.b32.xlu0 %v3660_v46, %s2930_s17  ;;  %2692 = vmatmul.mubr.msk.bf16.gmra.mxu0 %vm1749_vm15, %v1701_v12  ;;  %v1466_v0 = vsel %vm1442_vm7, %v3284_v49, %v3739_v39 }
  0xfa   : > { %1366 = vrot.lane.b32.xlu1 %v3728_v57, %s2930_s17  ;;  %v997_v6 = vor.u32 %v996_v63, %v993_v61 }
  0xfb   : > { %v1213_v20 = vpop.permute.xlu0 %1212 }
  0xfc   : > { %v3755_v7 = vpop.permute.xlu1 %1214  ;;  %v998_v60 = vrot.slane %v997_v6, 4 }
  0xfd   : > { %1399 = vrot.lane.b32.xlu0 %v3680_v31, %s2931_s24  ;;  %v1507_v62 = vsel %vm1491_vm8, %v1466_v0, %v3755_v7 }
  0xfe   : > { %1401 = vrot.lane.b32.xlu1 %v3751_v2, %s2931_s24 }
  0xff   : > { %v1248_v33 = vpop.permute.xlu0 %1247 }
 0x100   : > { %v3766_v35 = vpop.permute.xlu1 %1249 }
 0x101   : > { %1434 = vrot.lane.b32.xlu0 %v3702_v45, %s2932_s25  ;;  %v1540_v50 = vsel %vm1524_vm9, %v1507_v62, %v3766_v35  ;;  %v2466_v35 = vcombine.low %v3775_v15, %v3778_v55 }
 0x102   : > { %1148 = vrot.lane.b32.xlu1 %v3680_v31, %s2928_s15  ;;  %v985_v31 = vrot.slane %v3732_v47, 5  ;;  %v1006_v47 = vrot.slane %v1004_v24, 4 }
 0x103   : > { %v1283_v36 = vpop.permute.xlu0 %1282 }
 0x104   : > { %v1285_v40 = vpop.permute.xlu1 %1284  ;;  %v987_v51 = vrot.slane %v985_v31, 4  ;;  %v986_v48 = vsel %vm3054_vm4, %v2413_v59, %v985_v31  ;;  %v1007_v5 = vor.u32 %v1006_v47, %v1002_v43 }
 0x105   : > { %1436 = vrot.lane.b32.xlu0 %v3770_v27, %s2932_s25 }
 0x106   : > { %1150 = vrot.lane.b32.xlu1 %v3751_v2, %s2928_s15  ;;  %v989_v19 = vsel %vm3054_vm4, %v987_v51, %v988_v9  ;;  %v1008_v37 = vrot.slane %v1007_v5, 4 }
 0x107   : > { %v1318_v26 = vpop.permute.xlu0 %1317 }
 0x108   : > { %v1320_v10 = vpop.permute.xlu1 %1319  ;;  %v1013_v21 = vsel %vm3089_vm5, %v1008_v37, %v1012_v23 }
 0x109   : > { %1228 = vrot.lane.b32.xlu0 %v3702_v45, %s2927_s14  ;;  %v1463_v45 = vsel %vm1442_vm7, %v3260_v28, %v3713_v30 }
 0x10a   : > { %1230 = vrot.lane.b32.xlu1 %v3770_v27, %s2927_s14  ;;  %v1505_v17 = vsel %vm1491_vm8, %v1463_v45, %v1213_v20  ;;  %v2465_v20 = vcombine.low %v986_v48, %v989_v19 }
 0x10b   : > { %v1353_v12 = vpop.permute.xlu0 %1352  ;;  %v1538_v29 = vsel %vm1524_vm9, %v1505_v17, %v1248_v33 }
 0x10c   : > { %v1355_v54 = vpop.permute.xlu1 %1354  ;;  %v1571_v30 = vsel %vm1557_vm10, %v1538_v29, %v1283_v36  ;;  %v1019_v36 = vrot.slane %v3778_v55, 5 }
 0x10d   : > { %1263 = vrot.lane.b32.xlu0 %v3728_v57, %s2925_s12  ;;  %v1604_v53 = vsel %vm1590_vm11, %v1571_v30, %v1318_v26 }
 0x10e   : > { %1265 = vrot.lane.b32.xlu1 %v2463_v4, %s2925_s12  ;;  %v1637_v33 = vsel %vm1623_vm12, %v1604_v53, %v1353_v12  ;;  %v1021_v24 = vrot.slane %v1019_v36, 4  ;;  %s3917_s12 = sand.u32 1, %s2907_s19  }
 0x10f   : > { %v1388_v28 = vpop.permute.xlu0 %1387  ;;  %s2219_s8 = scalar_lea.sflag [#allocation3], %s3917_s12 }
 0x110   : > { %v1390_v22 = vpop.permute.xlu1 %1389  ;;  %v1670_v49 = vsel %vm1656_vm13, %v1637_v33, %v1388_v28  ;;  %v1023_v58 = vsel %vm3054_vm4, %v1021_v24, %v1022_v8 }
 0x111   : > { %1298 = vrot.lane.b32.xlu0 %v3751_v2, %s2929_s16  ;;  %v1573_v2 = vsel %vm1557_vm10, %v1540_v50, %v1285_v40  ;;  %v1003_v40 = vsel %vm3089_vm5, %v998_v60, %v1002_v43 }
 0x112   : > { %1300 = vrot.lane.b32.xlu1 %v2464_v44, %s2929_s16  ;;  %v1606_v7 = vsel %vm1590_vm11, %v1573_v2, %v1320_v10  ;;  %v2467_v55 = vcombine.low %v1003_v40, %v1013_v21  ;;  %s2393_s16 = sshll.u32 %s3917_s12, 7 }
 0x113   : > { %v1423_v39 = vpop.permute.xlu0 %1422  ;;  %v1639_v38 = vsel %vm1623_vm12, %v1606_v7, %v1355_v54 }
 0x114   : > { %v1137_v42 = vpop.permute.xlu1 %1136  ;;  %v1703_v32 = vsel %vm1689_vm14, %v1670_v49, %v1423_v39  ;;  %v1672_v41 = vsel %vm1656_vm13, %v1639_v38, %v1390_v22 }
 0x115   : > { %1333 = vrot.lane.b32.xlu0 %v3770_v27, %s2926_s13  ;;  %2695 = vmatprep.mubr.msk.bf16.mxu0 %vm1749_vm15, %v1703_v32  ;;  %v2414_v27 = vrot.slane %v3775_v15, 9  ;;  %v1469_v13 = vsel %vm1442_vm7, %v3320_v3, %v1137_v42 }
 0x116   : > { %1335 = vrot.lane.b32.xlu1 %v2465_v20, %s2926_s13  ;;  %s2934_s13 = smov [#allocation2]  }
 0x117   : > { %v1425_v31 = vpop.permute.xlu0 %1424  ;;  %v1020_v52 = vsel %vm3054_vm4, %v2414_v27, %v1019_v36  ;;  %s2821_s14 = sshll.u32 %s2934_s13, 4  ;;  %s2822_s14 = int_to_ptr.vmem [resolvable:$false] %s2821_s14 }
 0x118   : > { %v1139_v26 = vpop.permute.xlu1 %1138  ;;  %v1705_v10 = vsel %vm1689_vm14, %v1672_v41, %v1425_v31  ;;  %v2468_v59 = vcombine.low %v1020_v52, %v1023_v58 }
 0x119   : > { %1368 = vrot.lane.b32.xlu0 %v2463_v4, %s2930_s17  ;;  %2696 = vmatmul.mubr.msk.bf16.gmra.mxu0 %vm1749_vm15, %v1705_v10  ;;  %v1472_v6 = vsel %vm1442_vm7, %v3349_v56, %v1139_v26 }
 0x11a   : > { %1370 = vrot.lane.b32.xlu1 %v2466_v35, %s2930_s17  ;;  %s3929_s17 = scalar_lea.vmem [#allocation2], %s2393_s16  ;;  %s2823_s16 = scalar_lea.vmem %s2822_s14, 4096 }
 0x11b   : > { %v1217_v11 = vpop.permute.xlu0 %1216  ;;  %s2240_s27 = sshll.u32 %s3929_s17, 4  ;;  %s4005_s27 = int_to_ptr.vmem [resolvable:$true] %s2240_s27 }
 0x11c   : > { %v1219_v15 = vpop.permute.xlu1 %1218  ;;  %v1509_v14 = vsel %vm1491_vm8, %v1469_v13, %v1217_v11  ;;  %s2817_s9 = scalar_lea.vmem %s4005_s27, 2048  ;;  %p2824_p1 = scmp.lt.s32.totalorder %s4005_s27, %s2822_s14 }
 0x11d   : > { %1403 = vrot.lane.b32.xlu0 %v2464_v44, %s2931_s24  ;;  %v1511_v19 = vsel %vm1491_vm8, %v1472_v6, %v1219_v15  ;;  %p2818_p12 = scmp.ne.s32.totalorder %s4005_s27, %s2817_s9  ;;  %p2825_p2 = scmp.lt.s32.totalorder %s2823_s16, %s2817_s9 }
 0x11e   : > { %1405 = vrot.lane.b32.xlu1 %v2467_v55, %s2931_s24  ;;  %s2394_s24 = sshll.u32 %s3917_s12, 1 }
 0x11f   : > { %v1252_v61 = vpop.permute.xlu0 %1251  ;;  %p2819_p13 = pnand %p2818_p12, %p3007_p4  ;;  %p2826_p3 = por %p2825_p2, %p2824_p1 }
 0x120   : > { %v1254_v4 = vpop.permute.xlu1 %1253  ;;  %v1542_v54 = vsel %vm1524_vm9, %v1509_v14, %v1252_v61 }
 0x121   : > { %1438 = vrot.lane.b32.xlu0 %v2465_v20, %s2932_s25  ;;  %v1544_v25 = vsel %vm1524_vm9, %v1511_v19, %v1254_v4  ;;  %p2820_p0 = pneg %p2819_p13 }
 0x122   : > { %1440 = vrot.lane.b32.xlu1 %v2468_v59, %s2932_s25  ;;  %s3972_s25 = scalar_lea.vmem [#allocation4], %s2394_s24 }
 0x123   : > { %v1287_v63 = vpop.permute.xlu0 %1286  ;;  %p2827_p5 = pnand %p2826_p3, %p2820_p0 }
 0x124   : > { %v1289_v51 = vpop.permute.xlu1 %1288  ;;  %v1575_v44 = vsel %vm1557_vm10, %v1542_v54, %v1287_v63 }
 0x125   : > { %v1577_v28 = vsel %vm1557_vm10, %v1544_v25, %v1289_v51 }
 0x127   : > { %v1322_v9 = vpop.permute.xlu0 %1321 }
 0x128   : > { %v1324_v43 = vpop.permute.xlu1 %1323  ;;  %v1608_v17 = vsel %vm1590_vm11, %v1575_v44, %v1322_v9 }
 0x129   : > { %v1610_v0 = vsel %vm1590_vm11, %v1577_v28, %v1324_v43 }
 0x12b   : > { %v1357_v47 = vpop.permute.xlu0 %1356 }
 0x12c   : > { %v1359_v12 = vpop.permute.xlu1 %1358  ;;  %v1641_v5 = vsel %vm1623_vm12, %v1608_v17, %v1357_v47 }
 0x12d   : > { %v1643_v56 = vsel %vm1623_vm12, %v1610_v0, %v1359_v12 }
 0x12f   : > { %v1392_v45 = vpop.permute.xlu0 %1391 }
 0x130   : > { %v1394_v48 = vpop.permute.xlu1 %1393  ;;  %v1674_v3 = vsel %vm1656_vm13, %v1641_v5, %v1392_v45 }
 0x131   : > { %v1676_v53 = vsel %vm1656_vm13, %v1643_v56, %v1394_v48 }
 0x133   : > { %v1427_v29 = vpop.permute.xlu0 %1426 }
 0x134   : > { %v1141_v30 = vpop.permute.xlu1 %1140  ;;  %v1707_v22 = vsel %vm1689_vm14, %v1674_v3, %v1427_v29 }
 0x135   : > { %2699 = vmatprep.mubr.msk.bf16.mxu1 %vm1749_vm15, %v1707_v22  ;;  %v1475_v7 = vsel %vm1442_vm7, %v3415_v18, %v1141_v30 }
 0x137   : > { %v1429_v20 = vpop.permute.xlu0 %1428 }
 0x138   : > { %v1143_v60 = vpop.permute.xlu1 %1142  ;;  %v1709_v62 = vsel %vm1689_vm14, %v1676_v53, %v1429_v20 }
 0x139   : > { %2700 = vmatmul.mubr.msk.bf16.vlgmr.msra.gmra.mxu1 %vm1749_vm15, %v1709_v62  ;;  %v1478_v31 = vsel %vm1442_vm7, %v3469_v34, %v1143_v60 }
 0x13b   : > { %v1221_v33 = vpop.permute.xlu0 %1220 }
 0x13c   : > { %v1223_v37 = vpop.permute.xlu1 %1222  ;;  %v1513_v38 = vsel %vm1491_vm8, %v1475_v7, %v1221_v33 }
 0x13d   : > { %v1515_v24 = vsel %vm1491_vm8, %v1478_v31, %v1223_v37 }
 0x13f   : > { %v1256_v23 = vpop.permute.xlu0 %1255 }
 0x140   : > { %v1258_v50 = vpop.permute.xlu1 %1257  ;;  %v1546_v35 = vsel %vm1524_vm9, %v1513_v38, %v1256_v23 }
 0x141   : > { %v1548_v26 = vsel %vm1524_vm9, %v1515_v24, %v1258_v50  ;;  %v3922_v50 = vld [vmem:[%s4077_s3] ss:$0 sm:$0xff] }
 0x143   : > { %v1291_v49 = vpop.permute.xlu0 %1290 }
 0x144   : > { %v1293_v39 = vpop.permute.xlu1 %1292  ;;  %v1579_v21 = vsel %vm1557_vm10, %v1546_v35, %v1291_v49 }
 0x145   : > { %v1581_v55 = vsel %vm1557_vm10, %v1548_v26, %v1293_v39 }
 0x147   : > { %v1326_v36 = vpop.permute.xlu0 %1325 }
 0x148   : > { %v1328_v2 = vpop.permute.xlu1 %1327  ;;  %v1612_v27 = vsel %vm1590_vm11, %v1579_v21, %v1326_v36 }
 0x149   : > { %v1614_v58 = vsel %vm1590_vm11, %v1581_v55, %v1328_v2 }
 0x14b   : > { %v1361_v42 = vpop.permute.xlu0 %1360 }
 0x14c   : > { %v1363_v32 = vpop.permute.xlu1 %1362  ;;  %v1645_v8 = vsel %vm1623_vm12, %v1612_v27, %v1361_v42 }
 0x14d   : > { %v1647_v34 = vsel %vm1623_vm12, %v1614_v58, %v1363_v32 }
 0x14f   : > { %v1396_v40 = vpop.permute.xlu0 %1395 }
 0x150   : > { %v1398_v41 = vpop.permute.xlu1 %1397  ;;  %v1678_v18 = vsel %vm1656_vm13, %v1645_v8, %v1396_v40 }
 0x151   : > { %v1680_v15 = vsel %vm1656_vm13, %v1647_v34, %v1398_v41 }
 0x153   : > { %v1431_v10 = vpop.permute.xlu0 %1430 }
 0x154   : > { %v1145_v11 = vpop.permute.xlu1 %1144  ;;  %v1711_v52 = vsel %vm1689_vm14, %v1678_v18, %v1431_v10 }
 0x155   : > { %2703 = vmatprep.mubr.msk.bf16.mxu1 %vm1749_vm15, %v1711_v52  ;;  %v1481_v44 = vsel %vm1442_vm7, %v3535_v1, %v1145_v11 }
 0x157   : > { %v1433_v59 = vpop.permute.xlu0 %1432 }
 0x158   : > { %v1147_v61 = vpop.permute.xlu1 %1146  ;;  %v1713_v4 = vsel %vm1689_vm14, %v1680_v15, %v1433_v59 }
 0x159   : > { %2704 = vmatmul.mubr.msk.bf16.gmra.mxu1 %vm1749_vm15, %v1713_v4  ;;  %v1484_v25 = vsel %vm1442_vm7, %v3592_v16, %v1147_v61 }
 0x15b   : > { %v1225_v63 = vpop.permute.xlu0 %1224 }
 0x15c   : > { %v1227_v51 = vpop.permute.xlu1 %1226  ;;  %v1517_v48 = vsel %vm1491_vm8, %v1481_v44, %v1225_v63 }
 0x15d   : > { %v1519_v29 = vsel %vm1491_vm8, %v1484_v25, %v1227_v51 }
 0x15f   : > { %v1260_v9 = vpop.permute.xlu0 %1259 }
 0x160   : > { %v1262_v43 = vpop.permute.xlu1 %1261  ;;  %v1550_v6 = vsel %vm1524_vm9, %v1517_v48, %v1260_v9 }
 0x161   : > { %v1552_v1 = vsel %vm1524_vm9, %v1519_v29, %v1262_v43 }
 0x163   : > { %v1295_v47 = vpop.permute.xlu0 %1294 }
 0x164   : > { %v1297_v12 = vpop.permute.xlu1 %1296  ;;  %v1583_v19 = vsel %vm1557_vm10, %v1550_v6, %v1295_v47 }
 0x165   : > { %v1585_v0 = vsel %vm1557_vm10, %v1552_v1, %v1297_v12 }
 0x167   : > { %v1330_v13 = vpop.permute.xlu0 %1329 }
 0x168   : > { %v1332_v14 = vpop.permute.xlu1 %1331  ;;  %v1616_v3 = vsel %vm1590_vm11, %v1583_v19, %v1330_v13 }
 0x169   : > { %v1618_v20 = vsel %vm1590_vm11, %v1585_v0, %v1332_v14 }
 0x16b   : > { %v1365_v54 = vpop.permute.xlu0 %1364 }
 0x16c   : > { %v1367_v45 = vpop.permute.xlu1 %1366  ;;  %v1649_v28 = vsel %vm1623_vm12, %v1616_v3, %v1365_v54 }
 0x16d   : > { %v1651_v16 = vsel %vm1623_vm12, %v1618_v20, %v1367_v45 }
 0x16f   : > { %v1400_v17 = vpop.permute.xlu0 %1399 }
 0x170   : > { %v1402_v5 = vpop.permute.xlu1 %1401  ;;  %v1682_v30 = vsel %vm1656_vm13, %v1649_v28, %v1400_v17 }
 0x171   : > { %v1684_v60 = vsel %vm1656_vm13, %v1651_v16, %v1402_v5 }
 0x173   : > { %v1435_v22 = vpop.permute.xlu0 %1434 }
 0x174   : > { %v1149_v56 = vpop.permute.xlu1 %1148  ;;  %v1715_v53 = vsel %vm1689_vm14, %v1682_v30, %v1435_v22 }
 0x175   : > { %2707 = vmatprep.mubr.msk.bf16.mxu1 %vm1749_vm15, %v1715_v53  ;;  %v1487_v51 = vsel %vm1442_vm7, %v3660_v46, %v1149_v56 }
 0x177   : > { %v1437_v62 = vpop.permute.xlu0 %1436 }
 0x178   : > { %v1151_v33 = vpop.permute.xlu1 %1150  ;;  %v1717_v37 = vsel %vm1689_vm14, %v1684_v60, %v1437_v62 }
 0x179   : > { %v2685_v23 = vpop.f32.mrf.mxu0  ;;  %2708 = vmatmul.mubr.msk.bf16.gmra.mxu1 %vm1749_vm15, %v1717_v37  ;;  %v1490_v9 = vsel %vm1442_vm7, %v3728_v57, %v1151_v33 }
 0x17a   : > { %v1829_v42 = vadd.f32 %v2685_v23, %v3922_v50 }
 0x17b   : > { %v1820_v49 = vpop.f32.mrf.mxu0  ;;  %v1229_v39 = vpop.permute.xlu0 %1228 }
 0x17c   : > { %v1231_v36 = vpop.permute.xlu1 %1230  ;;  %v1821_v32 = vadd.f32 %v3922_v50, %v1820_v49  ;;  %v2146_v18 = vmul.f32 %v1829_v42, %v1829_v42  ;;  %v1521_v43 = vsel %vm1491_vm8, %v1487_v51, %v1229_v39 }
 0x17d   : > { %v2686_v2 = vpop.f32.mrf.mxu0  ;;  %v1523_v47 = vsel %vm1491_vm8, %v1490_v9, %v1231_v36 }
 0x17e   : > { %v1832_v7 = vadd.f32 %v2686_v2, %v3922_v50  ;;  %v2144_v31 = vmul.f32 %v1821_v32, %v1821_v32 }
 0x17f   : > { %v1823_v38 = vpop.f32.mrf.mxu0  ;;  %v1264_v35 = vpop.permute.xlu0 %1263 }
 0x180   : > { %v2571_v40 = vpack.c.bf16 %v1832_v7, %v1829_v42  ;;  %v1266_v21 = vpop.permute.xlu1 %1265  ;;  %v1824_v41 = vadd.f32 %v3922_v50, %v1823_v38  ;;  %v2147_v52 = vmul.f32 %v1832_v7, %v1832_v7  ;;  %v1554_v12 = vsel %vm1524_vm9, %v1521_v43, %v1264_v35 }
 0x181   : > { %v1556_v14 = vsel %vm1524_vm9, %v1523_v47, %v1266_v21 }
 0x182   : > { %2643 = vst [vmem:[%s3929_s17 + $0x8] sm:$0xff] %v2571_v40   ;;  %v2566_v27 = vpack.c.bf16 %v1824_v41, %v1821_v32  ;;  %v2107_v24 = vadd.f32 %v1824_v41, %v1821_v32  ;;  %v2145_v8 = vmul.f32 %v1824_v41, %v1824_v41 }
 0x183   : > { %v1299_v26 = vpop.permute.xlu0 %1298 }
 0x184   : > { %2567 = vst [vmem:[%s3929_s17] sm:$0xff] %v2566_v27   ;;  %v2108_v10 = vadd.f32 %v2107_v24, %v1829_v42  ;;  %v2176_v55 = vadd.f32 %v2145_v8, %v2144_v31  ;;  %v1301_v11 = vpop.permute.xlu1 %1300  ;;  %v1587_v54 = vsel %vm1557_vm10, %v1554_v12, %v1299_v26 }
 0x185   : > { %v1589_v44 = vsel %vm1557_vm10, %v1556_v14, %v1301_v11 }
 0x186   : > { %v2177_v58 = vadd.f32 %v2176_v55, %v2146_v18  ;;  %v2109_v34 = vadd.f32 %v2108_v10, %v1832_v7 }
 0x187   : > { %v1334_v15 = vpop.permute.xlu0 %1333 }
 0x188   : > { %v1336_v59 = vpop.permute.xlu1 %1335  ;;  %v2178_v61 = vadd.f32 %v2177_v58, %v2147_v52  ;;  %v1620_v48 = vsel %vm1590_vm11, %v1587_v54, %v1334_v15 }
 0x189   : > { %v1622_v46 = vsel %vm1590_vm11, %v1589_v44, %v1336_v59 }
 0x18b   : > { %v1369_v4 = vpop.permute.xlu0 %1368 }
 0x18c   : > { %v1371_v63 = vpop.permute.xlu1 %1370  ;;  %v1653_v57 = vsel %vm1623_vm12, %v1620_v48, %v1369_v4 }
 0x18d   : > { %v1655_v6 = vsel %vm1623_vm12, %v1622_v46, %v1371_v63 }
 0x18f   : > { %v1404_v13 = vpop.permute.xlu0 %1403 }
 0x190   : > { %v1406_v45 = vpop.permute.xlu1 %1405  ;;  %v1686_v17 = vsel %vm1656_vm13, %v1653_v57, %v1404_v13 }
 0x191   : > { %v1688_v5 = vsel %vm1656_vm13, %v1655_v6, %v1406_v45 }
 0x193   : > { %v1439_v19 = vpop.permute.xlu0 %1438 }
 0x194   : > { %v1441_v25 = vpop.permute.xlu1 %1440  ;;  %v1719_v3 = vsel %vm1689_vm14, %v1686_v17, %v1439_v19 }
 0x195   : > { %v1721_v29 = vsel %vm1689_vm14, %v1688_v5, %v1441_v25  ;;  %2711 = vmatprep.mubr.msk.bf16.mxu1 %vm1749_vm15, %v1719_v3 }
 0x196   : > { %2712 = vmatmul.mubr.msk.bf16.gmra.mxu1 %vm1749_vm15, %v1721_v29 }
 0x199   : > { %v2689_v28 = vpop.f32.mrf.mxu0 }
 0x19a   : > { %v1845_v0 = vadd.f32 %v2689_v28, %v3922_v50 }
 0x19b   : > { %v1836_v1 = vpop.f32.mrf.mxu0 }
 0x19c   : > { %v1837_v30 = vadd.f32 %v3922_v50, %v1836_v1  ;;  %v2150_v39 = vmul.f32 %v1845_v0, %v1845_v0 }
 0x19d   : > { %v2690_v22 = vpop.f32.mrf.mxu0 }
 0x19e   : > { %v2110_v56 = vadd.f32 %v2109_v34, %v1837_v30  ;;  %v2148_v53 = vmul.f32 %v1837_v30, %v1837_v30  ;;  %v1848_v20 = vadd.f32 %v2690_v22, %v3922_v50  ;;  %v2933_v22 = vmov 0.0  }
 0x19f   : > { %v1839_v16 = vpop.f32.mrf.mxu0  ;;  %351 = vst [vmem:[%s3972_s25] sm:$0x3] %v2933_v22 }
 0x1a0   : > { %v2179_v60 = vadd.f32 %v2178_v61, %v2148_v53  ;;  %v2581_v62 = vpack.c.bf16 %v1848_v20, %v1845_v0  ;;  %v1840_v33 = vadd.f32 %v3922_v50, %v1839_v16  ;;  %v2151_v42 = vmul.f32 %v1848_v20, %v1848_v20 }
 0x1a2   : > { %2645 = vst [vmem:[%s3929_s17 + $0x18] sm:$0xff] %v2581_v62   ;;  %v2576_v37 = vpack.c.bf16 %v1840_v33, %v1837_v30  ;;  %v2111_v23 = vadd.f32 %v2110_v56, %v1840_v33  ;;  %v2149_v49 = vmul.f32 %v1840_v33, %v1840_v33 }
 0x1a4   : > { %2644 = vst [vmem:[%s3929_s17 + $0x10] sm:$0xff] %v2576_v37   ;;  %v2112_v36 = vadd.f32 %v2111_v23, %v1845_v0  ;;  %v2180_v2 = vadd.f32 %v2179_v60, %v2149_v49 }
 0x1a6   : > { %v2181_v32 = vadd.f32 %v2180_v2, %v2150_v39  ;;  %v2113_v7 = vadd.f32 %v2112_v36, %v1848_v20 }
 0x1a8   : > { %v2182_v38 = vadd.f32 %v2181_v32, %v2151_v42 }
 0x1b9   : > { %v2693_v35 = vpop.f32.mrf.mxu0 }
 0x1ba   : > { %v1861_v31 = vadd.f32 %v2693_v35, %v3922_v50 }
 0x1bb   : > { %v1852_v40 = vpop.f32.mrf.mxu0 }
 0x1bc   : > { %v1853_v21 = vadd.f32 %v3922_v50, %v1852_v40  ;;  %v2154_v34 = vmul.f32 %v1861_v31, %v1861_v31 }
 0x1bd   : > { %v2694_v41 = vpop.f32.mrf.mxu0 }
 0x1be   : > { %v2114_v27 = vadd.f32 %v2113_v7, %v1853_v21  ;;  %v2152_v24 = vmul.f32 %v1853_v21, %v1853_v21  ;;  %v1864_v8 = vadd.f32 %v2694_v41, %v3922_v50 }
 0x1bf   : > { %v1855_v26 = vpop.f32.mrf.mxu0 }
 0x1c0   : > { %v2183_v18 = vadd.f32 %v2182_v38, %v2152_v24  ;;  %v2591_v10 = vpack.c.bf16 %v1864_v8, %v1861_v31  ;;  %v1856_v55 = vadd.f32 %v3922_v50, %v1855_v26  ;;  %v2155_v61 = vmul.f32 %v1864_v8, %v1864_v8 }
 0x1c2   : > { %2647 = vst [vmem:[%s3929_s17 + $0x28] sm:$0xff] %v2591_v10   ;;  %v2586_v11 = vpack.c.bf16 %v1856_v55, %v1853_v21  ;;  %v2115_v52 = vadd.f32 %v2114_v27, %v1856_v55  ;;  %v2153_v58 = vmul.f32 %v1856_v55, %v1856_v55 }
 0x1c4   : > { %2646 = vst [vmem:[%s3929_s17 + $0x20] sm:$0xff] %v2586_v11   ;;  %v2116_v15 = vadd.f32 %v2115_v52, %v1861_v31  ;;  %v2184_v59 = vadd.f32 %v2183_v18, %v2153_v58 }
 0x1c6   : > { %v2185_v4 = vadd.f32 %v2184_v59, %v2154_v34  ;;  %v2117_v63 = vadd.f32 %v2116_v15, %v1864_v8 }
 0x1c8   : > { %v2186_v51 = vadd.f32 %v2185_v4, %v2155_v61 }
 0x1d9   : > { %v2697_v9 = vpop.f32.mrf.mxu0 }
 0x1da   : > { %v1877_v13 = vadd.f32 %v2697_v9, %v3922_v50 }
 0x1db   : > { %v1868_v43 = vpop.f32.mrf.mxu0 }
 0x1dc   : > { %v1869_v47 = vadd.f32 %v3922_v50, %v1868_v43  ;;  %v2158_v5 = vmul.f32 %v1877_v13, %v1877_v13 }
 0x1dd   : > { %v2698_v12 = vpop.f32.mrf.mxu0 }
 0x1de   : > { %v2118_v14 = vadd.f32 %v2117_v63, %v1869_v47  ;;  %v2156_v54 = vmul.f32 %v1869_v47, %v1869_v47  ;;  %v1880_v45 = vadd.f32 %v2698_v12, %v3922_v50 }
 0x1df   : > { %v1871_v44 = vpop.f32.mrf.mxu0 }
 0x1e0   : > { %v2187_v48 = vadd.f32 %v2186_v51, %v2156_v54  ;;  %v2601_v46 = vpack.c.bf16 %v1880_v45, %v1877_v13  ;;  %v1872_v57 = vadd.f32 %v3922_v50, %v1871_v44  ;;  %v2159_v29 = vmul.f32 %v1880_v45, %v1880_v45 }
 0x1e2   : > { %2649 = vst [vmem:[%s3929_s17 + $0x38] sm:$0xff] %v2601_v46   ;;  %v2596_v6 = vpack.c.bf16 %v1872_v57, %v1869_v47  ;;  %v2119_v17 = vadd.f32 %v2118_v14, %v1872_v57  ;;  %v2157_v19 = vmul.f32 %v1872_v57, %v1872_v57 }
 0x1e4   : > { %2648 = vst [vmem:[%s3929_s17 + $0x30] sm:$0xff] %v2596_v6   ;;  %v2120_v25 = vadd.f32 %v2119_v17, %v1877_v13  ;;  %v2188_v3 = vadd.f32 %v2187_v48, %v2157_v19 }
 0x1e6   : > { %v2189_v28 = vadd.f32 %v2188_v3, %v2158_v5  ;;  %v2121_v1 = vadd.f32 %v2120_v25, %v1880_v45 }
 0x1e8   : > { %v2190_v30 = vadd.f32 %v2189_v28, %v2159_v29 }
 0x1f9   : > { %v2701_v0 = vpop.f32.mrf.mxu1 }
 0x1fa   : > { %v1893_v16 = vadd.f32 %v2701_v0, %v3922_v50 }
 0x1fb   : > { %v1884_v56 = vpop.f32.mrf.mxu1 }
 0x1fc   : > { %v1885_v53 = vadd.f32 %v3922_v50, %v1884_v56  ;;  %v2162_v32 = vmul.f32 %v1893_v16, %v1893_v16 }
 0x1fd   : > { %v2702_v20 = vpop.f32.mrf.mxu1 }
 0x1fe   : > { %v2122_v60 = vadd.f32 %v2121_v1, %v1885_v53  ;;  %v2160_v62 = vmul.f32 %v1885_v53, %v1885_v53  ;;  %v1896_v33 = vadd.f32 %v2702_v20, %v3922_v50 }
 0x1ff   : > { %v1887_v37 = vpop.f32.mrf.mxu1 }
 0x200   : > { %v2191_v23 = vadd.f32 %v2190_v30, %v2160_v62  ;;  %v2611_v49 = vpack.c.bf16 %v1896_v33, %v1893_v16  ;;  %v1888_v39 = vadd.f32 %v3922_v50, %v1887_v37  ;;  %v2163_v35 = vmul.f32 %v1896_v33, %v1896_v33 }
 0x202   : > { %2651 = vst [vmem:[%s3929_s17 + $0x48] sm:$0xff] %v2611_v49   ;;  %v2606_v36 = vpack.c.bf16 %v1888_v39, %v1885_v53  ;;  %v2123_v2 = vadd.f32 %v2122_v60, %v1888_v39  ;;  %v2161_v42 = vmul.f32 %v1888_v39, %v1888_v39 }
 0x204   : > { %2650 = vst [vmem:[%s3929_s17 + $0x40] sm:$0xff] %v2606_v36   ;;  %v2124_v7 = vadd.f32 %v2123_v2, %v1893_v16  ;;  %v2192_v38 = vadd.f32 %v2191_v23, %v2161_v42 }
 0x206   : > { %v2193_v40 = vadd.f32 %v2192_v38, %v2162_v32  ;;  %v2125_v21 = vadd.f32 %v2124_v7, %v1896_v33 }
 0x208   : > { %v2194_v41 = vadd.f32 %v2193_v40, %v2163_v35 }
 0x219   : > { %v2705_v31 = vpop.f32.mrf.mxu1 }
 0x21a   : > { %v1909_v8 = vadd.f32 %v2705_v31, %v3922_v50 }
 0x21b   : > { %v1900_v27 = vpop.f32.mrf.mxu1 }
 0x21c   : > { %v1901_v10 = vadd.f32 %v3922_v50, %v1900_v27  ;;  %v2166_v44 = vmul.f32 %v1909_v8, %v1909_v8 }
 0x21d   : > { %v2706_v24 = vpop.f32.mrf.mxu1 }
 0x21e   : > { %v1912_v26 = vadd.f32 %v2706_v24, %v3922_v50  ;;  %v2164_v47 = vmul.f32 %v1901_v10, %v1901_v10  ;;  %v2126_v12 = vadd.f32 %v2125_v21, %v1901_v10 }
 0x21f   : > { %v1903_v18 = vpop.f32.mrf.mxu1 }
 0x220   : > { %v2621_v55 = vpack.c.bf16 %v1912_v26, %v1909_v8  ;;  %v1904_v11 = vadd.f32 %v3922_v50, %v1903_v18  ;;  %v2195_v14 = vadd.f32 %v2194_v41, %v2164_v47  ;;  %v2167_v57 = vmul.f32 %v1912_v26, %v1912_v26 }
 0x222   : > { %2653 = vst [vmem:[%s3929_s17 + $0x58] sm:$0xff] %v2621_v55   ;;  %v2616_v52 = vpack.c.bf16 %v1904_v11, %v1901_v10  ;;  %v2165_v13 = vmul.f32 %v1904_v11, %v1904_v11  ;;  %v2127_v54 = vadd.f32 %v2126_v12, %v1904_v11 }
 0x224   : > { %2652 = vst [vmem:[%s3929_s17 + $0x50] sm:$0xff] %v2616_v52   ;;  %v2196_v45 = vadd.f32 %v2195_v14, %v2165_v13  ;;  %v2128_v48 = vadd.f32 %v2127_v54, %v1909_v8 }
 0x226   : > { %v2197_v46 = vadd.f32 %v2196_v45, %v2166_v44  ;;  %v2129_v6 = vadd.f32 %v2128_v48, %v1912_v26 }
 0x228   : > { %v2198_v5 = vadd.f32 %v2197_v46, %v2167_v57 }
 0x239   : > { %v2709_v58 = vpop.f32.mrf.mxu1 }
 0x23a   : > { %v1925_v59 = vadd.f32 %v2709_v58, %v3922_v50 }
 0x23b   : > { %v1916_v34 = vpop.f32.mrf.mxu1 }
 0x23c   : > { %v1917_v63 = vadd.f32 %v3922_v50, %v1916_v34  ;;  %v2170_v30 = vmul.f32 %v1925_v59, %v1925_v59 }
 0x23d   : > { %v2710_v15 = vpop.f32.mrf.mxu1 }
 0x23e   : > { %v1928_v61 = vadd.f32 %v2710_v15, %v3922_v50  ;;  %v2168_v17 = vmul.f32 %v1917_v63, %v1917_v63  ;;  %v2130_v19 = vadd.f32 %v2129_v6, %v1917_v63 }
 0x23f   : > { %v1919_v4 = vpop.f32.mrf.mxu1 }
 0x240   : > { %v2631_v51 = vpack.c.bf16 %v1928_v61, %v1925_v59  ;;  %v1920_v9 = vadd.f32 %v3922_v50, %v1919_v4  ;;  %v2199_v3 = vadd.f32 %v2198_v5, %v2168_v17  ;;  %v2171_v20 = vmul.f32 %v1928_v61, %v1928_v61 }
 0x242   : > { %2655 = vst [vmem:[%s3929_s17 + $0x68] sm:$0xff] %v2631_v51   ;;  %v2626_v43 = vpack.c.bf16 %v1920_v9, %v1917_v63  ;;  %v2169_v25 = vmul.f32 %v1920_v9, %v1920_v9  ;;  %v2131_v29 = vadd.f32 %v2130_v19, %v1920_v9 }
 0x244   : > { %2654 = vst [vmem:[%s3929_s17 + $0x60] sm:$0xff] %v2626_v43   ;;  %v2200_v28 = vadd.f32 %v2199_v3, %v2169_v25  ;;  %v2132_v22 = vadd.f32 %v2131_v29, %v1925_v59 }
 0x246   : > { %v2201_v56 = vadd.f32 %v2200_v28, %v2170_v30  ;;  %v2133_v62 = vadd.f32 %v2132_v22, %v1928_v61 }
 0x248   : > { %v2202_v39 = vadd.f32 %v2201_v56, %v2171_v20 }
 0x256   : > { %v2713_v1 = vpop.f32.mrf.mxu1 }
 0x257   : > { %v1941_v60 = vadd.f32 %v2713_v1, %v3922_v50 }
 0x258   : > { %v1932_v0 = vpop.f32.mrf.mxu1 }
 0x259   : > { %v1933_v53 = vadd.f32 %v3922_v50, %v1932_v0  ;;  %v2174_v35 = vmul.f32 %v1941_v60, %v1941_v60 }
 0x25a   : > { %v2714_v16 = vpop.f32.mrf.mxu1 }
 0x25b   : > { %v2172_v33 = vmul.f32 %v1933_v53, %v1933_v53  ;;  %v1944_v37 = vadd.f32 %v2714_v16, %v3922_v50  ;;  %v2134_v49 = vadd.f32 %v2133_v62, %v1933_v53 }
 0x25c   : > { %v1935_v23 = vpop.f32.mrf.mxu1 }
 0x25d   : > { %v2641_v36 = vpack.c.bf16 %v1944_v37, %v1941_v60  ;;  %v1936_v2 = vadd.f32 %v3922_v50, %v1935_v23  ;;  %v2203_v42 = vadd.f32 %v2202_v39, %v2172_v33 }
 0x25f   : > { %2657 = vst [vmem:[%s3929_s17 + $0x78] sm:$0xff] %v2641_v36   ;;  %v2636_v32 = vpack.c.bf16 %v1936_v2, %v1933_v53  ;;  %v2135_v7 = vadd.f32 %v2134_v49, %v1936_v2  ;;  %v2173_v38 = vmul.f32 %v1936_v2, %v1936_v2 }
 0x261   : > { %2656 = vst [vmem:[%s3929_s17 + $0x70] sm:$0xff] %v2636_v32   ;;  %v2136_v40 = vadd.f32 %v2135_v7, %v1941_v60  ;;  %v2204_v21 = vadd.f32 %v2203_v42, %v2173_v38 }
 0x262   : > { %2830 = shalt.err (!%p2827_p5)
}
 0x263   : > { %s2831_s17 = scalar_lea.hbm %s4002_s7, 2048  ;;  %s2835_s29 = scalar_lea.hbm %s4078_s4, 4096 }
 0x264   : > { %p2832_p6 = scmp.ne.s32.totalorder %s4002_s7, %s2831_s17  ;;  %p2836_p10 = scmp.lt.s32.totalorder %s4002_s7, %s4078_s4 }
 0x265   : > { %p2837_p11 = scmp.lt.s32.totalorder %s2835_s29, %s2831_s17 }
 0x266   : > { %p2833_p7 = pnand %p2832_p6, %p3007_p4 }
 0x267   : > { %p2838_p12 = por %p2837_p11, %p2836_p10 }
 0x268   : > { %p2834_p9 = pneg %p2833_p7 }
 0x26a   : > { %p2839_p13 = pnand %p2838_p12, %p2834_p9 }
 0x26c   : > { %2842 = shalt.err (!%p2839_p13)
}
 0x26d   : > { %s2935_s9 = smov 64   ;;  %v2175_v50 = vmul.f32 %v1944_v37, %v1944_v37  ;;  %v2137_v41 = vadd.f32 %v2136_v40, %v1944_v37  ;;  %v2205_v31 = vadd.f32 %v2204_v21, %v2174_v35  ;;  %vm2214_vm0 = vcmask 1040384   ;;  %v2213_v61 = vld [vmem:[%s3972_s25] sm:$0x3]  ;;  %s2224_s16 = scalar_lea.sflag [#allocation5], %s3917_s12 }
 0x26e   : > { %2725 = dma.vmem_to_hbm [thread:$0]  (%p3007_p4), %s4005_s27, 2048, %s4002_s7, %s2219_s8, %s2935_s9, %s2935_s9, %s2928_s15  }
 0x26f   : > { %v2138_v27 = vrot.slane %v2137_v41, 4  ;;  %v2206_v24 = vadd.f32 %v2205_v31, %v2175_v50  ;;  %s2525_s15 = sshll.u32 %s2915_s21, 5  ;;  %s2256_s27 = sshll.u32 %s3972_s25, 4  ;;  %s2257_s27 = int_to_ptr.vmem [resolvable:$true] %s2256_s27 }
 0x270   : > { %s2254_s14 = scalar_lea.hbm %s4079_s5, %s2525_s15  ;;  %s2843_s17 = scalar_lea.vmem %s2257_s27, 32 }
 0x271   : > { %v2139_v8 = vadd.f32 %v2138_v27, %v2137_v41  ;;  %v2207_v26 = vrot.slane %v2206_v24, 4  ;;  %p2844_p0 = scmp.ne.s32.totalorder %s2257_s27, %s2843_s17  ;;  %s2936_s24 = smov [#allocation4]  }
 0x272   : > { %s2847_s10 = sshll.u32 %s2936_s24, 4  ;;  %s2848_s10 = int_to_ptr.vmem [resolvable:$false] %s2847_s10 }
 0x273   : > { %v2140_v18 = vrot.slane %v2139_v8, 2  ;;  %v2208_v10 = vadd.f32 %v2207_v26, %v2206_v24  ;;  %p2845_p1 = pnand %p2844_p0, %p3007_p4  ;;  %s2849_s29 = scalar_lea.vmem %s2848_s10, 64 }
 0x274   : > { %p2850_p3 = scmp.lt.s32.totalorder %s2257_s27, %s2848_s10  ;;  %p2851_p5 = scmp.lt.s32.totalorder %s2849_s29, %s2843_s17 }
 0x275   : > { %v2141_v55 = vadd.f32 %v2140_v18, %v2139_v8  ;;  %v2209_v11 = vrot.slane %v2208_v10, 2  ;;  %p2846_p2 = pneg %p2845_p1 }
 0x276   : > { %p2852_p6 = por %p2851_p5, %p2850_p3 }
 0x277   : > { %v2142_v52 = vrot.slane %v2141_v55, 1  ;;  %v2210_v58 = vadd.f32 %v2209_v11, %v2208_v10 }
 0x278   : > { %p2853_p7 = pnand %p2852_p6, %p2846_p2 }
 0x279   : > { %v2211_v34 = vrot.slane %v2210_v58, 1  ;;  %v2143_v15 = vadd.f32 %v2142_v52, %v2141_v55 }
 0x27b   : > { %v2212_v59 = vadd.f32 %v2211_v34, %v2210_v58 }
 0x27d   : > { %v2215_v4 = vsel %vm2214_vm0, %v2143_v15, %v2212_v59 }
 0x27e   : > { %v2216_v63 = vadd.f32 %v2215_v4, %v2213_v61 }
 0x280   : > { %2217 = vst [vmem:[%s3972_s25] sm:$0x3] %v2216_v63 }
 0x281   : > { %2856 = shalt.err (!%p2853_p7)
}
 0x282   : > { %s2857_s21 = scalar_lea.hbm %s2254_s14, 32  ;;  %s2861_s11 = scalar_lea.hbm %s4079_s5, 64 }
 0x283   : > { %p2858_p9 = scmp.ne.s32.totalorder %s2254_s14, %s2857_s21  ;;  %p2862_p12 = scmp.lt.s32.totalorder %s2254_s14, %s4079_s5 }
 0x284   : > { %p2863_p13 = scmp.lt.s32.totalorder %s2861_s11, %s2857_s21 }
 0x285   : > { %p2859_p10 = pnand %p2858_p9, %p3007_p4 }
 0x286   : > { %p2864_p0 = por %p2863_p13, %p2862_p12 }
 0x287   : > { %p2860_p11 = pneg %p2859_p10 }
 0x289   : > { %p2865_p1 = pnand %p2864_p0, %p2860_p11 }
 0x28b   : > { %2868 = shalt.err (!%p2865_p1)
}
 0x28c   : > { %2726 = dma.vmem_to_hbm [thread:$0]  (%p3007_p4), %s2257_s27, 32, %s2254_s14, %s2224_s16  }
 0x28d PF: > { %p2737_p2 = scmp.ge.s32.totalorder %s2923_s23, 2  ;;  %s2268_s15 = sand.u32 1, %s2903_s18  }
 0x28e   : > { %s2269_s7 = scalar_lea.sflag [#allocation3], %s2268_s15 }
 0x28f   : > { %p2730_p3 = pnand %p2737_p2, %p3014_p8 }
 0x291   : > { %p2731_p5 = pneg %p2730_p3 }
 0x293   : > { %2894 = dma.done.wait (%p2731_p5), %s2269_s7, 2048  }
 0x294   : > { %2896 = vsyncadd (%p2731_p5), %s2269_s7, 4294965248  ;;  %s2278_s8 = scalar_lea.sflag [#allocation5], %s2268_s15 }
 0x295   : > { %2898 = dma.done.wait (%p2731_p5), %s2278_s8, 32  }
 0x296   : > { %2900 = vsyncadd (%p2731_p5), %s2278_s8, 4294967264  ;;  %s22_s23 = sadd.s32 1, %s2923_s23   ;;  %s4086_s18 = smov %s2907_s19 }
 0x297   : > { %p19_p6 = scmp.ge.s32.totalorder %s22_s23, 4   ;;  %s4087_s19 = smov %s2911_s20 }
 0x298   : > { %s4088_s20 = smov %s3020_s6  ;;  %s4089_s21 = smov %s2919_s22 }
 0x299   : > { %s4090_s22 = smov %s4092_s26  ;;  %21 = sbr.rel (!%p19_p6) target bundleno = 6 (0x6), region = 95 }
 0x29e   :  { %2283 = vsyncpa [#allocation3], 1 }
 0x29f   :  { %2285 = vsyncpa [#allocation3 + $0x1], 1 }
 0x2a0   :  { %2286 = vsyncpa [#allocation5], 1 }
 0x2a1   :  { %2288 = vsyncpa [#allocation5 + $0x1], 1 }

</bundles_post_ra>
